<compile_context>
chip_gen: v7x
topology: tpu7x:2x2x1
jax: 0.10.0
libtpu: 0.0.40
codegen_flags: <defaults>
</compile_context>

<pallas_src>
import math

import jax
import jax.numpy as jnp
from jax.experimental import pallas as pl
from jax.experimental.pallas import tpu as pltpu


# ----------------------------------------------------------------------------
# Kernels
# ----------------------------------------------------------------------------
def fused_small_kernel(scale_ref, adj_ref, x_ref, w1_ref, w2_ref, w3_ref,
                       b_ref, out_ref):
    """Whole-graph fused forward (adj is read from HBM exactly once).

    adj_ref  : [N, N] int8 binary structure A
    scale_ref: [N, 1] f32 per-row 1/deg  (module adj = scale * A)
    x_ref    : [N, F] bf16 features
    w1p/w2p/w3p: bf16 zero-padded weights, b: f32 padded bias
    out_ref  : [N, CP] f32 logits (lane padded)
    """
    a = adj_ref[...].astype(jnp.bfloat16)          # 0/1 -> exact in bf16
    s = scale_ref[...]
    # layer 1: h1 = relu( scale * (A @ x) @ W1 )       (== relu(adj @ (x @ W1)))
    t = jnp.dot(a, x_ref[...], preferred_element_type=jnp.float32)
    t = jnp.dot(t.astype(jnp.bfloat16), w1_ref[...],
                preferred_element_type=jnp.float32)
    h1 = jnp.maximum(t * s, 0.0).astype(jnp.bfloat16)
    # layer 2: h2 = relu( scale * (A @ (h1 @ W2)) )    (== relu(adj @ (h1 @ W2)))
    u = jnp.dot(h1, w2_ref[...], preferred_element_type=jnp.float32)
    v = jnp.dot(a, u.astype(jnp.bfloat16), preferred_element_type=jnp.float32)
    h2 = jnp.maximum(v * s, 0.0).astype(jnp.bfloat16)
    # head: y = h2 @ W3 + b   (bias added on the f32 accumulator)
    out_ref[...] = (jnp.dot(h2, w3_ref[...], preferred_element_type=jnp.float32)
                    + b_ref[...])


def layer1_kernel(scale_ref, adj_ref, x_ref, w1_ref, w2_ref, out_ref):
    """out_block = relu(scale * (A_block @ x) @ W1) @ W2   (bf16, lane dense)."""
    a = adj_ref[...].astype(jnp.bfloat16)
    t = jnp.dot(a, x_ref[...], preferred_element_type=jnp.float32)
    t = jnp.dot(t.astype(jnp.bfloat16), w1_ref[...],
                preferred_element_type=jnp.float32)
    h1 = jnp.maximum(t * scale_ref[...], 0.0).astype(jnp.bfloat16)
    out_ref[...] = jnp.dot(
        h1, w2_ref[...], preferred_element_type=jnp.float32).astype(out_ref.dtype)


def layer2_kernel(scale_ref, adj_ref, hin_ref, w3_ref, b_ref, out_ref):
    """out_block = relu(scale * (A_block @ h1w)) @ W3 + b  (f32, lane dense)."""
    a = adj_ref[...].astype(jnp.bfloat16)
    v = jnp.dot(a, hin_ref[...], preferred_element_type=jnp.float32)
    h2 = jnp.maximum(v * scale_ref[...], 0.0).astype(jnp.bfloat16)
    out_ref[...] = (jnp.dot(h2, w3_ref[...], preferred_element_type=jnp.float32)
                    + b_ref[...])


# ----------------------------------------------------------------------------
# Wrapper
# ----------------------------------------------------------------------------
def _round_up(x, m):
    return ((x + m - 1) // m) * m


def _vmem_limit_bytes():
    """Per-generation VMEM budget with headroom for compiler scratch."""
    cap = 128 << 20
    try:
        cap = int(getattr(pltpu.get_tpu_info(), "vmem_capacity_bytes", cap))
    except Exception:  # pragma: no cover - conservative fallback
        pass
    return max(32 << 20, min(cap - (16 << 20), 112 << 20))


def _fused_fits(n, f, hp, cp, budget):
    """Can the whole graph live in VMEM for the single fused call?"""
    need = (3 * n * n                       # adj int8 + its bf16 converted copy
            + n * f * 2                      # x bf16
            + (f * hp + hp * hp + hp * cp) * 2 + cp * 4   # weights + bias
            + n * 4                          # row scale
            + n * cp * 4                     # output block
            + 4 * n * hp * 4)                # f32 intermediates headroom
    return need * 1.25 < budget


def _pick_block_rows(n, bytes_needed, budget):
    """Largest row block that divides N, fits the VMEM budget, and leaves >=2
    grid blocks (so ("parallel",) can use both v7x TensorCores)."""
    for cand in (512, 256, 128, 64, 32):
        if n % cand == 0 and n // cand >= 2 and bytes_needed(cand) < budget:
            return cand
    # TODO(synk): pad the node axis instead; grid=(1,) loses megacore/pipelining.
    return n


def gnnq_forward(adj_bin, inv_deg, x, w1, w2, w3, b3, *, block_rows=None,
                 force_tiled=False):
    """Fused GNNq forward.

    adj_bin: [N,N] binary 0/1 structure, inv_deg: [N,1] f32 row scale
    (the module's adjacency is adj = diag(inv_deg) @ adj_bin),
    x: [N,F], w1: [F,H], w2: [H,H], w3: [H,C] (Linear weight pre-transposed),
    b3: [1,C].  Returns [N,C] float32.
    """
    n, f = x.shape
    h = w1.shape[1]
    c = w3.shape[1]
    hp = _round_up(max(h, 128), 128)     # lane-dense hidden width
    cp = _round_up(max(c, 128), 128)     # lane-dense output width

    # --- one-time wrapper-side casts / zero padding --------------------------
    adj_i8 = adj_bin.astype(jnp.int8)                    # 1 byte/elem, exact
    scale = inv_deg.reshape(n, 1).astype(jnp.float32)
    x_b = x.astype(jnp.bfloat16)
    w1p = jnp.zeros((f, hp), jnp.bfloat16).at[:, :h].set(w1.astype(jnp.bfloat16))
    w2p = jnp.zeros((hp, hp), jnp.bfloat16).at[:h, :h].set(w2.astype(jnp.bfloat16))
    w3p = jnp.zeros((hp, cp), jnp.bfloat16).at[:h, :c].set(w3.astype(jnp.bfloat16))
    b3p = jnp.zeros((1, cp), jnp.float32).at[:, :c].set(b3.astype(jnp.float32))

    budget = _vmem_limit_bytes()

    # --- small-graph path: one call, adj DMA'd exactly once ------------------
    if not force_tiled and _fused_fits(n, f, hp, cp, budget):
        y_pad = pl.pallas_call(
            fused_small_kernel,
            out_shape=jax.ShapeDtypeStruct((n, cp), jnp.float32),
            compiler_params=pltpu.CompilerParams(vmem_limit_bytes=budget),
            cost_estimate=pl.CostEstimate(
                flops=2 * n * n * (f + hp)
                      + 2 * n * (f * hp + hp * hp + hp * cp),
                transcendentals=0,
                bytes_accessed=n * n + 2 * (n * f + f * hp + hp * hp + hp * cp)
                               + 4 * (n + cp + n * cp)),
        )(scale, adj_i8, x_b, w1p, w2p, w3p, b3p)
        return y_pad[:, :c]

    # --- tiled path: row-parallel grid, 2 calls (adj streamed twice) ---------
    def bytes_needed(tm):
        adj_b = 2 * tm * n + 2 * tm * n          # int8 slab (x2 buf) + bf16 copy
        residents = (2 * max(n * f * 2, n * hp * 2)
                     + 2 * (f * hp + hp * hp + hp * cp) * 2 + 2 * cp * 4)
        out_b = 2 * max(tm * hp * 2, tm * cp * 4)
        return int((adj_b + residents + out_b + 2 * tm * 4) * 1.25)

    if block_rows is None:
        block_rows = _pick_block_rows(n, bytes_needed, budget)
    assert n % block_rows == 0, "node count must be a multiple of block_rows"
    grid = (n // block_rows,)

    cparams = pltpu.CompilerParams(
        dimension_semantics=("parallel",),
        vmem_limit_bytes=budget,
    )

    def row_spec(cols):
        return pl.BlockSpec((block_rows, cols), lambda i: (i, 0))

    def resident(shape):
        # Constant index_map: DMA'd once, stays resident across the row grid.
        # TODO(synk): pipeline_mode=pl.Buffered(1) on these for v7x VMEM savings.
        return pl.BlockSpec(shape, lambda i: tuple(0 for _ in shape))

    # call 1: h1w = relu(scale * (A @ x) @ W1) @ W2   (projection folded in)
    h1w = pl.pallas_call(
        layer1_kernel,
        out_shape=jax.ShapeDtypeStruct((n, hp), jnp.bfloat16),
        grid=grid,
        in_specs=[row_spec(1), row_spec(n), resident((n, f)),
                  resident((f, hp)), resident((hp, hp))],
        out_specs=row_spec(hp),
        compiler_params=cparams,
        cost_estimate=pl.CostEstimate(
            flops=2 * n * n * f + 2 * n * f * hp + 2 * n * hp * hp,
            transcendentals=0,
            bytes_accessed=n * n + 2 * (n * f + f * hp + hp * hp + n * hp)
                           + 4 * n),
    )(scale, adj_i8, x_b, w1p, w2p)

    # call 2: y = relu(scale * (A @ h1w)) @ W3 + b3   (lane-dense f32 out)
    y_pad = pl.pallas_call(
        layer2_kernel,
        out_shape=jax.ShapeDtypeStruct((n, cp), jnp.float32),
        grid=grid,
        in_specs=[row_spec(1), row_spec(n), resident((n, hp)),
                  resident((hp, cp)), resident((1, cp))],
        out_specs=row_spec(cp),
        compiler_params=cparams,
        cost_estimate=pl.CostEstimate(
            flops=2 * n * n * hp + 2 * n * hp * cp + n * cp,
            transcendentals=0,
            bytes_accessed=n * n + 2 * (n * hp + hp * cp)
                           + 4 * (cp + n * cp + n)),
    )(scale, adj_i8, h1w, w3p, b3p)

    # strip the lane padding once, wrapper-side
    return y_pad[:, :c]


# ----------------------------------------------------------------------------
# Reference + deterministic data
# ----------------------------------------------------------------------------
def _reference(adj, x, w1, w2, w3, b3):
    h = jnp.maximum(adj @ (x @ w1), 0.0)
    h = jnp.maximum(adj @ (h @ w2), 0.0)
    return h @ w3 + b3


def _make_params(key, feature_num, hidden_dim, class_num):
    """Mirror the PyTorch module's parameter shapes (W stored as [in, out])."""
    k1, k2, k3, k4 = jax.random.split(key, 4)
    s1 = 1.0 / math.sqrt(hidden_dim)
    w1 = jax.random.uniform(k1, (feature_num, hidden_dim), jnp.float32, -s1, s1)
    s2 = 1.0 / math.sqrt(hidden_dim)
    w2 = jax.random.uniform(k2, (hidden_dim, hidden_dim), jnp.float32, -s2, s2)
    s3 = 1.0 / math.sqrt(hidden_dim)
    # nn.Linear weight [class, hidden] stored pre-transposed as [hidden, class]
    w3 = jax.random.uniform(k3, (hidden_dim, class_num), jnp.float32, -s3, s3)
    b3 = jax.random.uniform(k4, (1, class_num), jnp.float32, -s3, s3)
    return w1, w2, w3, b3


def _make_graph(key, n):
    """Binary symmetric adjacency with self-loops + its row-normalized form."""
    a = (jax.random.uniform(key, (n, n), jnp.float32) < 0.1).astype(jnp.float32)
    a = jnp.maximum(a, a.T)
    a = jnp.maximum(a, jnp.eye(n, dtype=jnp.float32))     # keep entries in {0,1}
    deg = jnp.sum(a, axis=1, keepdims=True)
    inv_deg = 1.0 / deg
    adj_dense = a * inv_deg        # the module's adj (stand-in for spmm adj)
    return a, inv_deg, adj_dense


if __name__ == "__main__":
    # Shapes consistent with the module's forward:
    #   feature_num=64, hidden_dim=32, class_num=8
    F_IN, H, C = 64, 32, 8
    key = jax.random.PRNGKey(0)
    k_adj, k_x, k_p, k_adj2, k_x2 = jax.random.split(key, 5)
    w1, w2, w3, b3 = _make_params(k_p, F_IN, H, C)

    # --- small graph (N=256): exercises the single fused call path ----------
    N = 256
    a_bin, inv_deg, adj = _make_graph(k_adj, N)
    x = jax.random.normal(k_x, (N, F_IN), jnp.float32)
    out = jax.block_until_ready(gnnq_forward(a_bin, inv_deg, x, w1, w2, w3, b3))
    ref = _reference(adj, x, w1, w2, w3, b3)
    assert out.shape == (N, C)
    err = float(jnp.max(jnp.abs(out - ref)))
    assert jnp.allclose(out, ref, atol=2e-2, rtol=2e-2), f"fused max abs err {err}"

    # --- larger graph (N=1024): exercises the row-tiled two-call path -------
    N2 = 1024
    a_bin2, inv_deg2, adj2 = _make_graph(k_adj2, N2)
    x2 = jax.random.normal(k_x2, (N2, F_IN), jnp.float32)
    out2 = jax.block_until_ready(
        gnnq_forward(a_bin2, inv_deg2, x2, w1, w2, w3, b3, force_tiled=True))
    ref2 = _reference(adj2, x2, w1, w2, w3, b3)
    assert out2.shape == (N2, C)
    err2 = float(jnp.max(jnp.abs(out2 - ref2)))
    assert jnp.allclose(out2, ref2, atol=2e-2, rtol=2e-2), f"tiled max abs err {err2}"

    print("KERNEL_OK")
</pallas_src>

<mosaic_0001>
module attributes {stable_mosaic.version = 11 : i64} {
  func.func @fused_small_kernel(%arg0: memref<256x1xf32, #tpu.memory_space<vmem>>, %arg1: memref<256x256xi8, #tpu.memory_space<vmem>>, %arg2: memref<256x64xbf16, #tpu.memory_space<vmem>>, %arg3: memref<64x128xbf16, #tpu.memory_space<vmem>>, %arg4: memref<128x128xbf16, #tpu.memory_space<vmem>>, %arg5: memref<128x128xbf16, #tpu.memory_space<vmem>>, %arg6: memref<1x128xf32, #tpu.memory_space<vmem>>, %arg7: memref<256x128xf32, #tpu.memory_space<vmem>>) attributes {dimension_semantics = [], scalar_prefetch = 0 : i64, scratch_operands = 0 : i64, tpu.core_type = #tpu.core_type<tc>} {
    %c0 = arith.constant 0 : index
    %c0_0 = arith.constant 0 : index
    %0 = vector.load %arg1[%c0, %c0_0] : memref<256x256xi8, #tpu.memory_space<vmem>>, vector<256x256xi8>
    %1 = arith.sitofp %0 : vector<256x256xi8> to vector<256x256xbf16>
    %c0_1 = arith.constant 0 : index
    %c0_2 = arith.constant 0 : index
    %2 = vector.load %arg0[%c0_1, %c0_2] : memref<256x1xf32, #tpu.memory_space<vmem>>, vector<256x1xf32>
    %c0_3 = arith.constant 0 : index
    %c0_4 = arith.constant 0 : index
    %3 = vector.load %arg2[%c0_3, %c0_4] : memref<256x64xbf16, #tpu.memory_space<vmem>>, vector<256x64xbf16>
    %cst = arith.constant dense<0.000000e+00> : vector<256x64xf32>
    %4 = tpu.matmul %1, %3, %cst {dimension_numbers = #tpu.dot_dimension_numbers<[1], [0], [0], [1], [0, 0, 1, 1], [], []>} : vector<256x256xbf16>, vector<256x64xbf16>, vector<256x64xf32> -> vector<256x64xf32>
    %5 = arith.truncf %4 : vector<256x64xf32> to vector<256x64xbf16>
    %c0_5 = arith.constant 0 : index
    %c0_6 = arith.constant 0 : index
    %6 = vector.load %arg3[%c0_5, %c0_6] : memref<64x128xbf16, #tpu.memory_space<vmem>>, vector<64x128xbf16>
    %cst_7 = arith.constant dense<0.000000e+00> : vector<256x128xf32>
    %7 = tpu.matmul %5, %6, %cst_7 {dimension_numbers = #tpu.dot_dimension_numbers<[1], [0], [0], [1], [0, 0, 1, 1], [], []>} : vector<256x64xbf16>, vector<64x128xbf16>, vector<256x128xf32> -> vector<256x128xf32>
    %8 = vector.broadcast %2 : vector<256x1xf32> to vector<256x128xf32>
    %9 = arith.mulf %7, %8 : vector<256x128xf32>
    %cst_8 = arith.constant 0.000000e+00 : f32
    %10 = vector.broadcast %cst_8 : f32 to vector<256x128xf32>
    %11 = arith.maximumf %9, %10 : vector<256x128xf32>
    %12 = arith.truncf %11 : vector<256x128xf32> to vector<256x128xbf16>
    %c0_9 = arith.constant 0 : index
    %c0_10 = arith.constant 0 : index
    %13 = vector.load %arg4[%c0_9, %c0_10] : memref<128x128xbf16, #tpu.memory_space<vmem>>, vector<128x128xbf16>
    %cst_11 = arith.constant dense<0.000000e+00> : vector<256x128xf32>
    %14 = tpu.matmul %12, %13, %cst_11 {dimension_numbers = #tpu.dot_dimension_numbers<[1], [0], [0], [1], [0, 0, 1, 1], [], []>} : vector<256x128xbf16>, vector<128x128xbf16>, vector<256x128xf32> -> vector<256x128xf32>
    %15 = arith.truncf %14 : vector<256x128xf32> to vector<256x128xbf16>
    %cst_12 = arith.constant dense<0.000000e+00> : vector<256x128xf32>
    %16 = tpu.matmul %1, %15, %cst_12 {dimension_numbers = #tpu.dot_dimension_numbers<[1], [0], [0], [1], [0, 0, 1, 1], [], []>} : vector<256x256xbf16>, vector<256x128xbf16>, vector<256x128xf32> -> vector<256x128xf32>
    %17 = vector.broadcast %2 : vector<256x1xf32> to vector<256x128xf32>
    %18 = arith.mulf %16, %17 : vector<256x128xf32>
    %cst_13 = arith.constant 0.000000e+00 : f32
    %19 = vector.broadcast %cst_13 : f32 to vector<256x128xf32>
    %20 = arith.maximumf %18, %19 : vector<256x128xf32>
    %21 = arith.truncf %20 : vector<256x128xf32> to vector<256x128xbf16>
    %c0_14 = arith.constant 0 : index
    %c0_15 = arith.constant 0 : index
    %22 = vector.load %arg5[%c0_14, %c0_15] : memref<128x128xbf16, #tpu.memory_space<vmem>>, vector<128x128xbf16>
    %cst_16 = arith.constant dense<0.000000e+00> : vector<256x128xf32>
    %23 = tpu.matmul %21, %22, %cst_16 {dimension_numbers = #tpu.dot_dimension_numbers<[1], [0], [0], [1], [0, 0, 1, 1], [], []>} : vector<256x128xbf16>, vector<128x128xbf16>, vector<256x128xf32> -> vector<256x128xf32>
    %c0_17 = arith.constant 0 : index
    %c0_18 = arith.constant 0 : index
    %24 = vector.load %arg6[%c0_17, %c0_18] : memref<1x128xf32, #tpu.memory_space<vmem>>, vector<1x128xf32>
    %25 = vector.broadcast %24 : vector<1x128xf32> to vector<256x128xf32>
    %26 = arith.addf %23, %25 : vector<256x128xf32>
    %c0_19 = arith.constant 0 : index
    %c0_20 = arith.constant 0 : index
    %27 = vector.load %arg7[%c0_19, %c0_20] : memref<256x128xf32, #tpu.memory_space<vmem>>, vector<256x128xf32>
    tpu.vector_store %arg7[%c0_19, %c0_20], %26 {strides = array<i32>} : memref<256x128xf32, #tpu.memory_space<vmem>>, vector<256x128xf32>,
    return
  }
}

</mosaic_0001>

<bundles_post_ra>
// kernel: tpu_custom_call.1
= control target key start
LH: loop header
LB: loop body
LE: loop exit
PB: predicated region body
PF: predicated region fallthrough
CT: control target
= control target key end

     0   :  { %12 = vsyncpa [#allocation3], 0  ;;  %s3048_s0 = inlined_call_operand.hbm [shape: f32[256,1], index: 0, kind: input, shape index: {}]   ;;  %s3049_s1 = inlined_call_operand.hbm [shape: s8[256,256], index: 1, kind: input, shape index: {}]   ;;  %s3050_s2 = inlined_call_operand.hbm [shape: bf16[256,64], index: 2, kind: input, shape index: {}]   ;;  %s3051_s3 = inlined_call_operand.hbm [shape: bf16[64,128], index: 3, kind: input, shape index: {}]   ;;  %s3052_s4 = inlined_call_operand.hbm [shape: bf16[128,128], index: 4, kind: input, shape index: {}]   ;;  %s3053_s5 = inlined_call_operand.hbm [shape: bf16[128,128], index: 5, kind: input, shape index: {}]   ;;  %s3054_s6 = inlined_call_operand.hbm [shape: f32[1,128], index: 6, kind: input, shape index: {}]   ;;  %s3055_s7 = inlined_call_operand.hbm [shape: f32[256,128], index: 7, kind: output, shape index: {}]  }
   0x1   :  { %13 = vsyncpa [#allocation6], 0 }
   0x2   :  { %14 = vsyncpa [#allocation9], 0 }
   0x3   :  { %15 = vsyncpa [#allocation12], 0 }
   0x4   :  { %16 = vsyncpa [#allocation4], 0  ;;  %s2498_s24 = smov [#allocation5]   ;;  %s2312_s28 = scalar_lea.hbm %s3049_s1, 2048 }
   0x5   :  { %s34_s25 = sshll.u32 %s2498_s24, 4  ;;  %p2313_p0 = scmp.ne.s32.totalorder %s3049_s1, %s2312_s28  ;;  %s35_s25 = int_to_ptr.vmem [resolvable:$true] %s34_s25 }
   0x6   :  { %p2316_p1 = scmp.lt.u32.totalorder %s2312_s28, %s3049_s1 }
   0x8   :  { %p2318_p2 = pnand %p2316_p1, %p2313_p0 }
   0xa   :  { %2321 = shalt.err (!%p2318_p2)
}
   0xb   :  { %s2322_s10 = scalar_lea.vmem %s35_s25, 2048  ;;  %p2327_p4 = scmp.lt.s32.totalorder %s35_s25, %s35_s25 }
   0xc   :  { %p2323_p3 = scmp.ne.s32.totalorder %s35_s25, %s2322_s10  ;;  %p2328_p5 = scmp.lt.s32.totalorder %s2322_s10, %s2322_s10 }
   0xe   :  { %p2329_p6 = por %p2328_p5, %p2327_p4 }
  0x10   :  { %p2330_p7 = pnand %p2329_p6, %p2323_p3 }
  0x12   :  { %2333 = shalt.err (!%p2330_p7)
}
  0x13   :  { %s2499_s11 = smov 256   ;;  %s2500_s12 = smov 16  }
  0x14   :  { %40 = dma.hbm_to_vmem [thread:$0]  %s3049_s1, 2048, %s35_s25, [#allocation6], %s2499_s11, %s2499_s11, %s2500_s12  }
  0x15   :  { %s2501_s15 = smov [#allocation8]   ;;  %s2502_s17 = smov [#allocation11]  }
  0x16   :  { %s58_s16 = sshll.u32 %s2501_s15, 4  ;;  %s82_s18 = sshll.u32 %s2502_s17, 4  ;;  %s59_s16 = int_to_ptr.vmem [resolvable:$true] %s58_s16  ;;  %s83_s18 = int_to_ptr.vmem [resolvable:$true] %s82_s18 }
  0x17   :  { %s2334_s21 = scalar_lea.hbm %s3051_s3, 512 }
  0x18   :  { %p2335_p8 = scmp.ne.s32.totalorder %s3051_s3, %s2334_s21  ;;  %p2338_p9 = scmp.lt.u32.totalorder %s2334_s21, %s3051_s3 }
  0x1a   :  { %p2340_p10 = pnand %p2338_p9, %p2335_p8 }
  0x1c   :  { %2343 = shalt.err (!%p2340_p10)
}
  0x1d   :  { %s2344_s1 = scalar_lea.vmem %s59_s16, 512  ;;  %p2349_p12 = scmp.lt.s32.totalorder %s59_s16, %s59_s16 }
  0x1e   :  { %p2345_p11 = scmp.ne.s32.totalorder %s59_s16, %s2344_s1  ;;  %p2350_p13 = scmp.lt.s32.totalorder %s2344_s1, %s2344_s1 }
  0x20   :  { %p2351_p0 = por %p2350_p13, %p2349_p12 }
  0x22   :  { %p2352_p1 = pnand %p2351_p0, %p2345_p11 }
  0x24   :  { %2355 = shalt.err (!%p2352_p1)
}
  0x25   :  { %s2503_s25 = smov 64   ;;  %s2504_s27 = smov 4  }
  0x26   :  { %64 = dma.hbm_to_vmem [thread:$0]  %s3051_s3, 512, %s59_s16, [#allocation9], %s2503_s25, %s2503_s25, %s2504_s27  }
  0x27   :  { %s2356_s9 = scalar_lea.hbm %s3053_s5, 1024 }
  0x28   :  { %p2357_p2 = scmp.ne.s32.totalorder %s3053_s5, %s2356_s9  ;;  %p2360_p3 = scmp.lt.u32.totalorder %s2356_s9, %s3053_s5 }
  0x2a   :  { %p2362_p4 = pnand %p2360_p3, %p2357_p2 }
  0x2c   :  { %2365 = shalt.err (!%p2362_p4)
}
  0x2d   :  { %s2366_s14 = scalar_lea.vmem %s83_s18, 1024  ;;  %p2371_p6 = scmp.lt.s32.totalorder %s83_s18, %s83_s18 }
  0x2e   :  { %p2367_p5 = scmp.ne.s32.totalorder %s83_s18, %s2366_s14  ;;  %p2372_p7 = scmp.lt.s32.totalorder %s2366_s14, %s2366_s14 }
  0x30   :  { %p2373_p8 = por %p2372_p7, %p2371_p6 }
  0x32   :  { %p2374_p9 = pnand %p2373_p8, %p2367_p5 }
  0x34   :  { %2377 = shalt.err (!%p2374_p9)
}
  0x35   :  { %88 = dma.hbm_to_vmem [thread:$0]  %s3053_s5, 1024, %s83_s18, [#allocation12], %s2503_s25, %s2503_s25, %s2504_s27  }
  0x36   :  { %s2505_s16 = smov [#allocation2]   ;;  %s2378_s21 = scalar_lea.hbm %s3048_s0, 4096 }
  0x37   :  { %s22_s17 = sshll.u32 %s2505_s16, 4  ;;  %p2379_p10 = scmp.ne.s32.totalorder %s3048_s0, %s2378_s21  ;;  %s23_s17 = int_to_ptr.vmem [resolvable:$true] %s22_s17 }
  0x38   :  { %p2382_p11 = scmp.lt.u32.totalorder %s2378_s21, %s3048_s0 }
  0x3a   :  { %p2384_p12 = pnand %p2382_p11, %p2379_p10 }
  0x3c   :  { %2387 = shalt.err (!%p2384_p12)
}
  0x3d   :  { %s2388_s1 = scalar_lea.vmem %s23_s17, 4096  ;;  %p2393_p0 = scmp.lt.s32.totalorder %s23_s17, %s23_s17 }
  0x3e   :  { %p2389_p13 = scmp.ne.s32.totalorder %s23_s17, %s2388_s1  ;;  %p2394_p1 = scmp.lt.s32.totalorder %s2388_s1, %s2388_s1 }
  0x40   :  { %p2395_p2 = por %p2394_p1, %p2393_p0 }
  0x42   :  { %p2396_p3 = pnand %p2395_p2, %p2389_p13 }
  0x44   :  { %2399 = shalt.err (!%p2396_p3)
}
  0x45   :  { %s2506_s5 = smov 128   ;;  %s2507_s18 = smov 8  }
  0x46   :  { %28 = dma.hbm_to_vmem [thread:$0]  %s3048_s0, 4096, %s23_s17, [#allocation3], %s2506_s5, %s2506_s5, %s2507_s18  }
  0x47   :  { %s2508_s30 = smov [#allocation7]   ;;  %s2509_s9 = smov [#allocation10]  }
  0x48   :  { %s46_s8 = sshll.u32 %s2508_s30, 4  ;;  %s70_s10 = sshll.u32 %s2509_s9, 4  ;;  %s47_s8 = int_to_ptr.vmem [resolvable:$true] %s46_s8  ;;  %s2610_s10 = int_to_ptr.vmem [resolvable:$true] %s70_s10 }
  0x49   :  { %s2400_s13 = scalar_lea.hbm %s3050_s2, 2048 }
  0x4a   :  { %p2401_p4 = scmp.ne.s32.totalorder %s3050_s2, %s2400_s13  ;;  %p2404_p5 = scmp.lt.u32.totalorder %s2400_s13, %s3050_s2 }
  0x4c   :  { %p2406_p6 = pnand %p2404_p5, %p2401_p4 }
  0x4e   :  { %2409 = shalt.err (!%p2406_p6)
}
  0x4f   :  { %s2410_s0 = scalar_lea.vmem %s47_s8, 2048  ;;  %p2415_p8 = scmp.lt.s32.totalorder %s47_s8, %s47_s8 }
  0x50   :  { %p2411_p7 = scmp.ne.s32.totalorder %s47_s8, %s2410_s0  ;;  %p2416_p9 = scmp.lt.s32.totalorder %s2410_s0, %s2410_s0 }
  0x52   :  { %p2417_p10 = por %p2416_p9, %p2415_p8 }
  0x54   :  { %p2418_p11 = pnand %p2417_p10, %p2411_p7 }
  0x56   :  { %2421 = shalt.err (!%p2418_p11)
}
  0x57   :  { %52 = dma.hbm_to_vmem [thread:$0]  %s3050_s2, 2048, %s47_s8, [#allocation6], %s2503_s25, %s2503_s25, %s2504_s27  }
  0x58   :  { %s2422_s22 = scalar_lea.hbm %s3052_s4, 1024 }
  0x59   :  { %p2423_p12 = scmp.ne.s32.totalorder %s3052_s4, %s2422_s22  ;;  %p2426_p13 = scmp.lt.u32.totalorder %s2422_s22, %s3052_s4 }
  0x5b   :  { %p2428_p0 = pnand %p2426_p13, %p2423_p12 }
  0x5d   :  { %2431 = shalt.err (!%p2428_p0)
}
  0x5e   :  { %s2432_s28 = scalar_lea.vmem %s2610_s10, 1024  ;;  %p2437_p2 = scmp.lt.s32.totalorder %s2610_s10, %s2610_s10 }
  0x5f   :  { %p2433_p1 = scmp.ne.s32.totalorder %s2610_s10, %s2432_s28  ;;  %p2438_p3 = scmp.lt.s32.totalorder %s2432_s28, %s2432_s28 }
  0x61   :  { %p2439_p4 = por %p2438_p3, %p2437_p2 }
  0x63   :  { %p2440_p5 = pnand %p2439_p4, %p2433_p1 }
  0x65   :  { %2443 = shalt.err (!%p2440_p5)
}
  0x66   :  { %76 = dma.hbm_to_vmem [thread:$0]  %s3052_s4, 1024, %s2610_s10, [#allocation9], %s2503_s25, %s2503_s25, %s2504_s27  }
  0x67   :  { %s2510_s30 = smov [#allocation13]   ;;  %s2444_s12 = scalar_lea.hbm %s3054_s6, 16 }
  0x68   :  { %s95_s8 = sshll.u32 %s2510_s30, 4  ;;  %p2445_p6 = scmp.ne.s32.totalorder %s3054_s6, %s2444_s12  ;;  %s96_s8 = int_to_ptr.vmem [resolvable:$true] %s95_s8 }
  0x69   :  { %p2448_p7 = scmp.lt.u32.totalorder %s2444_s12, %s3054_s6 }
  0x6b   :  { %p2450_p8 = pnand %p2448_p7, %p2445_p6 }
  0x6d   :  { %2453 = shalt.err (!%p2450_p8)
}
  0x6e   :  { %s2454_s16 = scalar_lea.vmem %s96_s8, 16  ;;  %s2458_s4 = scalar_lea.vmem %s96_s8, 32 }
  0x6f   :  { %p2455_p9 = scmp.ne.s32.totalorder %s96_s8, %s2454_s16  ;;  %p2459_p10 = scmp.lt.s32.totalorder %s96_s8, %s96_s8 }
  0x70   :  { %p2460_p11 = scmp.lt.s32.totalorder %s2458_s4, %s2454_s16 }
  0x72   :  { %p2461_p12 = por %p2460_p11, %p2459_p10 }
  0x74   :  { %p2462_p13 = pnand %p2461_p12, %p2455_p9 }
  0x76   :  { %2465 = shalt.err (!%p2462_p13)
}
  0x77   :  { %98 = dma.hbm_to_vmem [thread:$0]  %s3054_s6, 16, %s96_s8, [#allocation12]  }
  0x78   :  { %2488 = dma.done.wait [#allocation3], 4096  }
  0x79   :  { %2489 = vsyncadd [#allocation3], 4294963200 }
  0x7a   :  { %2490 = dma.done.wait [#allocation6], 4096  }
  0x7b   :  { %2491 = vsyncadd [#allocation6], 4294963200 }
  0x7c   :  { %2492 = dma.done.wait [#allocation9], 1536  }
  0x7d   :  { %2493 = vsyncadd [#allocation9], 4294965760 }
  0x7e   :  { %2494 = dma.done.wait [#allocation12], 1040  }
  0x7f   :  { %2495 = vsyncadd [#allocation12], 4294966256  ;;  %v2276_v0 = vld [vmem:[#allocation7 + $0x40] sm:$0xff]   ;;  %v2278_v2 = vld [vmem:[#allocation7 + $0x48] sm:$0xff]   ;;  %vm538_vm0 = vcmask 523264   ;;  %s2512_s6 = smov [#allocation14]  }
  0x80   :  { %v2277_v1 = vld [vmem:[#allocation7] sm:$0xff]   ;;  %1807 = vmatprep.subr.bf16.mxu0 %v2276_v0  ;;  %v2279_v3 = vld [vmem:[#allocation7 + $0x8] sm:$0xff]   ;;  %v2280_v4 = vld [vmem:[#allocation7 + $0x50] sm:$0xff]   ;;  %s1739_s10 = sshll.u32 %s2512_s6, 4  ;;  %s1740_s10 = int_to_ptr.vmem [resolvable:$true] %s1739_s10 }
  0x81   :  { %1808 = vmatpush3.bf16.msra.mxu0 %v2277_v1  ;;  %v2281_v5 = vld [vmem:[#allocation7 + $0x10] sm:$0xff]   ;;  %v2282_v6 = vld [vmem:[#allocation7 + $0x58] sm:$0xff]   ;;  %v2284_v8 = vld [vmem:[#allocation7 + $0x60] sm:$0xff]   ;;  %s2466_s0 = scalar_lea.vmem %s1740_s10, 4096  ;;  %p2471_p1 = scmp.lt.s32.totalorder %s1740_s10, %s1740_s10 }
  0x82   :  { %1809 = vmatprep.subr.bf16.mxu0 %v2278_v2  ;;  %v2283_v7 = vld [vmem:[#allocation7 + $0x18] sm:$0xff]   ;;  %v2285_v9 = vld [vmem:[#allocation7 + $0x20] sm:$0xff]   ;;  %v2286_v10 = vld [vmem:[#allocation7 + $0x68] sm:$0xff]   ;;  %p2467_p0 = scmp.ne.s32.totalorder %s1740_s10, %s2466_s0  ;;  %p2472_p2 = scmp.lt.s32.totalorder %s2466_s0, %s2466_s0 }
  0x83   :  { %v2659_v11 = vld [vmem:[#allocation5 + $0x8] sm:$0xff]  ;;  %v2288_v14 = vld [vmem:[#allocation7 + $0x70] sm:$0xff]   ;;  %v2290_v16 = vld [vmem:[#allocation7 + $0x78] sm:$0xff]  }
  0x84   :  { %v138_v12 = vunpack.c.l.s8.bf16 %v2659_v11  ;;  %v2287_v13 = vld [vmem:[#allocation7 + $0x28] sm:$0xff]   ;;  %v2289_v15 = vld [vmem:[#allocation7 + $0x30] sm:$0xff]   ;;  %v2291_v17 = vld [vmem:[#allocation7 + $0x38] sm:$0xff]   ;;  %v3085_v22 = vunpack.c.h.s8.bf16 %v2659_v11  ;;  %p2473_p3 = por %p2472_p2, %p2471_p1 }
  0x85   :  { %1810 = vmatpush3.bf16.msra.mxu0 %v2279_v3  ;;  %v2664_v18 = vld [vmem:[#allocation5] sm:$0xff]  ;;  %v2293_v20 = vld [vmem:[#allocation8 + $0x8] sm:$0xff]   ;;  %v2672_v23 = vld [vmem:[#allocation5 + $0x18] sm:$0xff] }
  0x86   :  { %1811 = vmatprep.subr.bf16.mxu0 %v2280_v4  ;;  %361 = vmatprep.mubr.bf16.mxu0 %v138_v12  ;;  %v2292_v19 = vld [vmem:[#allocation8] sm:$0xff]   ;;  %v3086_v21 = vunpack.c.l.s8.bf16 %v2664_v18  ;;  %v3084_v24 = vunpack.c.h.s8.bf16 %v2664_v18  ;;  %v3083_v25 = vunpack.c.l.s8.bf16 %v2672_v23  ;;  %v2680_v26 = vld [vmem:[#allocation5 + $0x10] sm:$0xff]  ;;  %v3081_v28 = vunpack.c.h.s8.bf16 %v2672_v23  ;;  %v2688_v29 = vld [vmem:[#allocation5 + $0x28] sm:$0xff]  ;;  %p2474_p4 = pnand %p2473_p3, %p2467_p0 }
  0x87   :  { %2235 = vmatprep.subr.bf16.mxu1 %v2292_v19  ;;  %v3082_v27 = vunpack.c.l.s8.bf16 %v2680_v26  ;;  %v3080_v30 = vunpack.c.h.s8.bf16 %v2680_v26  ;;  %v3079_v31 = vunpack.c.l.s8.bf16 %v2688_v29  ;;  %v2696_v32 = vld [vmem:[#allocation5 + $0x20] sm:$0xff]  ;;  %v3077_v34 = vunpack.c.h.s8.bf16 %v2688_v29  ;;  %v2704_v35 = vld [vmem:[#allocation5 + $0x38] sm:$0xff]  ;;  %v2712_v38 = vld [vmem:[#allocation5 + $0x30] sm:$0xff] }
  0x88   :  { %2239 = vmatpush3.bf16.msra.mxu1 %v2292_v19  ;;  %v3078_v33 = vunpack.c.l.s8.bf16 %v2696_v32  ;;  %v3076_v36 = vunpack.c.h.s8.bf16 %v2696_v32  ;;  %v3075_v37 = vunpack.c.l.s8.bf16 %v2704_v35  ;;  %v3074_v39 = vunpack.c.l.s8.bf16 %v2712_v38  ;;  %v2720_v41 = vld [vmem:[#allocation5 + $0x48] sm:$0xff]  ;;  %v2728_v44 = vld [vmem:[#allocation5 + $0x40] sm:$0xff]  ;;  %v2736_v47 = vld [vmem:[#allocation5 + $0x58] sm:$0xff] }
  0x89   :  { %1812 = vmatpush3.bf16.msra.mxu0 %v2281_v5  ;;  %2236 = vmatprep.subr.bf16.mxu1 %v2293_v20  ;;  %v3073_v40 = vunpack.c.h.s8.bf16 %v2704_v35  ;;  %v3072_v42 = vunpack.c.h.s8.bf16 %v2712_v38  ;;  %v3071_v43 = vunpack.c.l.s8.bf16 %v2720_v41  ;;  %v3070_v45 = vunpack.c.l.s8.bf16 %v2728_v44  ;;  %v2744_v50 = vld [vmem:[#allocation5 + $0x50] sm:$0xff]  ;;  %v2752_v53 = vld [vmem:[#allocation5 + $0x68] sm:$0xff]  ;;  %v2760_v56 = vld [vmem:[#allocation5 + $0x60] sm:$0xff] }
  0x8a   :  { %1813 = vmatprep.subr.bf16.mxu0 %v2282_v6  ;;  %v3069_v46 = vunpack.c.h.s8.bf16 %v2720_v41  ;;  %v3068_v48 = vunpack.c.h.s8.bf16 %v2728_v44  ;;  %v3067_v49 = vunpack.c.l.s8.bf16 %v2736_v47  ;;  %v3066_v51 = vunpack.c.l.s8.bf16 %v2744_v50  ;;  %v2294_v57 = vld [vmem:[#allocation8 + $0x10] sm:$0xff]   ;;  %v2295_v60 = vld [vmem:[#allocation8 + $0x18] sm:$0xff]   ;;  %v169_v4 = vld [vmem:[#allocation2] sm:$0xff] }
  0x8b   :  { %v3065_v52 = vunpack.c.h.s8.bf16 %v2736_v47  ;;  %v3064_v54 = vunpack.c.h.s8.bf16 %v2744_v50  ;;  %v3063_v55 = vunpack.c.l.s8.bf16 %v2752_v53  ;;  %v3062_v58 = vunpack.c.l.s8.bf16 %v2760_v56  ;;  %v2768_v61 = vld [vmem:[#allocation5 + $0x78] sm:$0xff]  ;;  %v2776_v0 = vld [vmem:[#allocation5 + $0x70] sm:$0xff] }
  0x8c   :  { %2240 = vmatpush3.bf16.msra.mxu1 %v2293_v20  ;;  %v3061_v59 = vunpack.c.h.s8.bf16 %v2752_v53  ;;  %v3060_v62 = vunpack.c.h.s8.bf16 %v2760_v56  ;;  %v3059_v63 = vunpack.c.l.s8.bf16 %v2768_v61  ;;  %v3058_v1 = vunpack.c.l.s8.bf16 %v2776_v0  ;;  %v171_v5 = vld [vmem:[#allocation2 + $0x10] sm:$0xff] }
  0x8d   :  { %1814 = vmatpush3.bf16.msra.mxu0 %v2283_v7  ;;  %2237 = vmatprep.subr.bf16.mxu1 %v2294_v57  ;;  %v3057_v2 = vunpack.c.h.s8.bf16 %v2768_v61  ;;  %v3056_v3 = vunpack.c.h.s8.bf16 %v2776_v0  ;;  %v2511_v6 = vmov 0   ;;  %v170_v7 = vld [vmem:[#allocation2 + $0x8] sm:$0xff] }
  0x8e   :  { %1815 = vmatprep.subr.bf16.mxu0 %v2284_v8  ;;  %2274 = vset.pattern.permute.xlu0 %v2511_v6  ;;  %v172_v8 = vld [vmem:[#allocation2 + $0x18] sm:$0xff] }
  0x8f   :  { %2275 = vset.pattern.permute.xlu1 %v2511_v6  ;;  %750 = vperm.xlu0 %2274, %v169_v4   ;;  %v184_v4 = vld [vmem:[#allocation2 + $0x78] sm:$0xff]  ;;  %v186_v6 = vld [vmem:[#allocation2 + $0x88] sm:$0xff] }
  0x90   :  { %2241 = vmatpush3.bf16.msra.mxu1 %v2294_v57  ;;  %760 = vperm.xlu1 %2275, %v171_v5   ;;  %v185_v5 = vld [vmem:[#allocation2 + $0x80] sm:$0xff] }
  0x91   :  { %1816 = vmatpush3.bf16.msra.mxu0 %v2285_v9  ;;  %2238 = vmatprep.subr.bf16.mxu1 %v2295_v60  ;;  %v173_v9 = vld [vmem:[#allocation2 + $0x20] sm:$0xff] }
  0x92   :  { %1817 = vmatprep.subr.bf16.mxu0 %v2286_v10  ;;  %v174_v10 = vld [vmem:[#allocation2 + $0x28] sm:$0xff] }
  0x93   :  { %755 = vperm.xlu0 %2274, %v170_v7   ;;  %v187_v7 = vld [vmem:[#allocation2 + $0x90] sm:$0xff] }
  0x94   :  { %2242 = vmatpush3.bf16.msra.mxu1 %v2295_v60  ;;  %765 = vperm.xlu1 %2275, %v172_v8   ;;  %v188_v8 = vld [vmem:[#allocation2 + $0x98] sm:$0xff] }
  0x95   :  { %1818 = vmatpush3.bf16.msra.mxu0 %v2287_v13  ;;  %v175_v13 = vld [vmem:[#allocation2 + $0x30] sm:$0xff] }
  0x96   :  { %1819 = vmatprep.subr.bf16.mxu0 %v2288_v14  ;;  %v176_v14 = vld [vmem:[#allocation2 + $0x38] sm:$0xff] }
  0x97   :  { %770 = vperm.xlu0 %2274, %v173_v9   ;;  %v189_v9 = vld [vmem:[#allocation2 + $0xa0] sm:$0xff] }
  0x98   :  { %775 = vperm.xlu1 %2275, %v174_v10   ;;  %v190_v10 = vld [vmem:[#allocation2 + $0xa8] sm:$0xff] }
  0x99   :  { %1820 = vmatpush3.bf16.msra.mxu0 %v2289_v15  ;;  %v177_v15 = vld [vmem:[#allocation2 + $0x40] sm:$0xff] }
  0x9a   :  { %1821 = vmatprep.subr.bf16.mxu0 %v2290_v16  ;;  %v178_v16 = vld [vmem:[#allocation2 + $0x48] sm:$0xff] }
  0x9b   :  { %780 = vperm.xlu0 %2274, %v175_v13   ;;  %v191_v13 = vld [vmem:[#allocation2 + $0xb0] sm:$0xff] }
  0x9c   :  { %785 = vperm.xlu1 %2275, %v176_v14   ;;  %v192_v14 = vld [vmem:[#allocation2 + $0xb8] sm:$0xff] }
  0x9d   :  { %1822 = vmatpush3.bf16.msra.mxu0 %v2291_v17  ;;  %v179_v17 = vld [vmem:[#allocation2 + $0x50] sm:$0xff] }
  0x9e   :  { %2099 = vmatprep.subr.bf16.mxu0 %v2292_v19 }
  0x9f   :  { %790 = vperm.xlu0 %2274, %v177_v15   ;;  %v193_v15 = vld [vmem:[#allocation2 + $0xc0] sm:$0xff] }
  0xa0   :  { %362 = vmatmul.mubr.bf16.vlgmr.msra.gmra.mrb[0].mxu0 %v3086_v21  ;;  %795 = vperm.xlu1 %2275, %v178_v16   ;;  %v194_v16 = vld [vmem:[#allocation2 + $0xc8] sm:$0xff] }
  0xa1   :  { %369 = vmatprep.mubr.bf16.mxu0 %v3085_v22  ;;  %2100 = vmatpush3.bf16.msra.mxu0 %v2292_v19  ;;  %v180_v19 = vld [vmem:[#allocation2 + $0x58] sm:$0xff] }
  0xa2   :  { %2101 = vmatprep.subr.bf16.mxu0 %v2293_v20 }
  0xa3   :  { %800 = vperm.xlu0 %2274, %v179_v17   ;;  %v195_v17 = vld [vmem:[#allocation2 + $0xd0] sm:$0xff] }
  0xa4   :  { %805 = vperm.xlu1 %2275, %v180_v19   ;;  %v196_v19 = vld [vmem:[#allocation2 + $0xd8] sm:$0xff] }
  0xa5   :  { %2102 = vmatpush3.bf16.msra.mxu0 %v2293_v20  ;;  %v181_v20 = vld [vmem:[#allocation2 + $0x60] sm:$0xff] }
  0xa6   :  { %2103 = vmatprep.subr.bf16.mxu0 %v2294_v57 }
  0xa7   :  { %810 = vperm.xlu0 %2274, %v181_v20   ;;  %v197_v20 = vld [vmem:[#allocation2 + $0xe0] sm:$0xff] }
  0xa8   :  { %370 = vmatmul.mubr.bf16.gmra.mrb[4].mxu0 %v3084_v24 }
  0xa9   :  { %377 = vmatprep.mubr.bf16.mxu0 %v3083_v25  ;;  %2104 = vmatpush3.bf16.msra.mxu0 %v2294_v57  ;;  %v182_v57 = vld [vmem:[#allocation2 + $0x68] sm:$0xff] }
  0xaa   :  { %2105 = vmatprep.subr.bf16.mxu0 %v2295_v60  ;;  %815 = vperm.xlu1 %2275, %v182_v57  }
  0xad   :  { %2106 = vmatpush3.bf16.msra.mxu0 %v2295_v60  ;;  %v183_v60 = vld [vmem:[#allocation2 + $0x70] sm:$0xff] }
  0xae   :  { %820 = vperm.xlu0 %2274, %v183_v60   ;;  %825 = vperm.xlu1 %2275, %v184_v4   ;;  %v198_v60 = vld [vmem:[#allocation2 + $0xe8] sm:$0xff]  ;;  %v199_v4 = vld [vmem:[#allocation2 + $0xf0] sm:$0xff] }
  0xb0   :  { %378 = vmatmul.mubr.bf16.gmra.mrb[8].mxu0 %v3082_v27 }
  0xb1   :  { %385 = vmatprep.mubr.bf16.mxu0 %v3081_v28 }
  0xb2   :  { %830 = vperm.xlu0 %2274, %v185_v5   ;;  %835 = vperm.xlu1 %2275, %v186_v6   ;;  %v2787_v5 = vld [vmem:[#allocation10] sm:$0xff]  }
  0xb3   :  { %2139 = vmatprep.subr.bf16.mxu1 %v2787_v5 }
  0xb6   :  { %840 = vperm.xlu0 %2274, %v187_v7   ;;  %845 = vperm.xlu1 %2275, %v188_v8  }
  0xb8   :  { %386 = vmatmul.mubr.bf16.gmra.mrb[12].mxu0 %v3080_v30 }
  0xb9   :  { %393 = vmatprep.mubr.bf16.mxu0 %v3079_v31 }
  0xba   :  { %850 = vperm.xlu0 %2274, %v189_v9   ;;  %855 = vperm.xlu1 %2275, %v190_v10  }
  0xbe   :  { %860 = vperm.xlu0 %2274, %v191_v13   ;;  %865 = vperm.xlu1 %2275, %v192_v14   ;;  %v200_v13 = vld [vmem:[#allocation2 + $0xf8] sm:$0xff] }
  0xc0   :  { %394 = vmatmul.mubr.bf16.gmra.mrb[16].mxu0 %v3078_v33 }
  0xc1   :  { %401 = vmatprep.mubr.bf16.mxu0 %v3077_v34 }
  0xc2   :  { %870 = vperm.xlu0 %2274, %v193_v15   ;;  %875 = vperm.xlu1 %2275, %v194_v16  }
  0xc6   :  { %880 = vperm.xlu0 %2274, %v195_v17   ;;  %885 = vperm.xlu1 %2275, %v196_v19  }
  0xc8   :  { %402 = vmatmul.mubr.bf16.gmra.mrb[20].mxu0 %v3076_v36 }
  0xc9   :  { %409 = vmatprep.mubr.bf16.mxu0 %v3075_v37 }
  0xca   :  { %890 = vperm.xlu0 %2274, %v197_v20   ;;  %895 = vperm.xlu1 %2275, %v198_v60  }
  0xce   :  { %900 = vperm.xlu0 %2274, %v199_v4   ;;  %905 = vperm.xlu1 %2275, %v200_v13  }
  0xd0   :  { %410 = vmatmul.mubr.bf16.gmra.mrb[24].mxu0 %v3074_v39 }
  0xd1   :  { %417 = vmatprep.mubr.bf16.mxu0 %v3073_v40 }
  0xd8   :  { %418 = vmatmul.mubr.bf16.gmra.mrb[28].mxu0 %v3072_v42 }
  0xd9   :  { %425 = vmatprep.mubr.bf16.mxu0 %v3071_v43 }
  0xe0   :  { %426 = vmatmul.mubr.bf16.gmra.mrb[32].mxu0 %v3070_v45 }
  0xe1   :  { %433 = vmatprep.mubr.bf16.mxu0 %v3069_v46 }
  0xe8   :  { %434 = vmatmul.mubr.bf16.gmra.mrb[36].mxu0 %v3068_v48 }
  0xe9   :  { %441 = vmatprep.mubr.bf16.mxu0 %v3067_v49 }
  0xf0   :  { %442 = vmatmul.mubr.bf16.gmra.mrb[40].mxu0 %v3066_v51 }
  0xf1   :  { %449 = vmatprep.mubr.bf16.mxu0 %v3065_v52 }
  0xf8   :  { %450 = vmatmul.mubr.bf16.gmra.mrb[44].mxu0 %v3064_v54 }
  0xf9   :  { %457 = vmatprep.mubr.bf16.mxu0 %v3063_v55 }
 0x100   :  { %458 = vmatmul.mubr.bf16.gmra.mrb[48].mxu0 %v3062_v58 }
 0x101   :  { %465 = vmatprep.mubr.bf16.mxu0 %v3061_v59 }
 0x108   :  { %466 = vmatmul.mubr.bf16.gmra.mrb[52].mxu0 %v3060_v62 }
 0x109   :  { %473 = vmatprep.mubr.bf16.mxu0 %v3059_v63 }
 0x110   :  { %474 = vmatmul.mubr.bf16.gmra.mrb[56].mxu0 %v3058_v1 }
 0x111   :  { %481 = vmatprep.mubr.bf16.mxu0 %v3057_v2 }
 0x118   :  { %482 = vmatmul.mubr.bf16.gmra.mrb[60].mxu0 %v3056_v3 }
 0x173   :  { %v1823_v57 = vpop.f32.mrb[0].mxu0 }
 0x174   :  { %v1824_v6 = vpop.f32.mrb[1].mxu0 }
 0x175   :  { %v1825_v7 = vadd.f32 %v1824_v6, %v1823_v57  ;;  %v1826_v8 = vpop.f32.mrb[2].mxu0 }
 0x176   :  { %v1827_v9 = vpop.f32.mrb[3].mxu0 }
 0x177   :  { %v1828_v10 = vadd.f32 %v1827_v9, %v1826_v8 }
 0x179   :  { %v490_v14 = vpack.c.bf16 %v1828_v10, %v1825_v7 }
 0x17b   :  { %v1829_v15 = vpop.f32.mrb[4].mxu0  ;;  %2107 = vmatprep.mubr.msk.bf16.mxu0 %vm538_vm0, %v490_v14 }
 0x17c   :  { %v1830_v16 = vpop.f32.mrb[5].mxu0 }
 0x17d   :  { %v1831_v17 = vadd.f32 %v1830_v16, %v1829_v15  ;;  %v1832_v19 = vpop.f32.mrb[6].mxu0 }
 0x17e   :  { %v1833_v20 = vpop.f32.mrb[7].mxu0 }
 0x17f   :  { %v1834_v3 = vadd.f32 %v1833_v20, %v1832_v19 }
 0x181   :  { %v491_v57 = vpack.c.bf16 %v1834_v3, %v1831_v17 }
 0x183   :  { %v1835_v6 = vpop.f32.mrb[8].mxu0  ;;  %2108 = vmatmul.mubr.msk.bf16.vlgmr.msra.gmra.mrb[64].mxu0 %vm538_vm0, %v491_v57 }
 0x184   :  { %v1836_v2 = vpop.f32.mrb[9].mxu0 }
 0x185   :  { %v1837_v60 = vadd.f32 %v1836_v2, %v1835_v6  ;;  %v1838_v4 = vpop.f32.mrb[10].mxu0 }
 0x186   :  { %v1839_v8 = vpop.f32.mrb[11].mxu0 }
 0x187   :  { %v1840_v9 = vadd.f32 %v1839_v8, %v1838_v4 }
 0x189   :  { %v492_v1 = vpack.c.bf16 %v1840_v9, %v1837_v60 }
 0x18b   :  { %v1841_v7 = vpop.f32.mrb[12].mxu0  ;;  %2111 = vmatprep.mubr.msk.bf16.mxu0 %vm538_vm0, %v492_v1 }
 0x18c   :  { %v1842_v10 = vpop.f32.mrb[13].mxu0 }
 0x18d   :  { %v1843_v13 = vadd.f32 %v1842_v10, %v1841_v7  ;;  %v1844_v14 = vpop.f32.mrb[14].mxu0 }
 0x18e   :  { %v1845_v15 = vpop.f32.mrb[15].mxu0 }
 0x18f   :  { %v1846_v16 = vadd.f32 %v1845_v15, %v1844_v14 }
 0x191   :  { %v493_v63 = vpack.c.bf16 %v1846_v16, %v1843_v13 }
 0x193   :  { %v1847_v19 = vpop.f32.mrb[16].mxu0  ;;  %2112 = vmatmul.mubr.msk.bf16.gmra.mrb[68].mxu0 %vm538_vm0, %v493_v63 }
 0x194   :  { %v1848_v3 = vpop.f32.mrb[17].mxu0 }
 0x195   :  { %v1849_v17 = vadd.f32 %v1848_v3, %v1847_v19  ;;  %v1850_v20 = vpop.f32.mrb[18].mxu0 }
 0x196   :  { %v1851_v2 = vpop.f32.mrb[19].mxu0 }
 0x197   :  { %v1852_v57 = vadd.f32 %v1851_v2, %v1850_v20 }
 0x199   :  { %v494_v6 = vpack.c.bf16 %v1852_v57, %v1849_v17 }
 0x19b   :  { %v1853_v4 = vpop.f32.mrb[20].mxu0  ;;  %2115 = vmatprep.mubr.msk.bf16.mxu0 %vm538_vm0, %v494_v6 }
 0x19c   :  { %v1854_v60 = vpop.f32.mrb[21].mxu0 }
 0x19d   :  { %v1855_v1 = vadd.f32 %v1854_v60, %v1853_v4  ;;  %v1856_v8 = vpop.f32.mrb[22].mxu0 }
 0x19e   :  { %v1857_v9 = vpop.f32.mrb[23].mxu0 }
 0x19f   :  { %v1858_v7 = vadd.f32 %v1857_v9, %v1856_v8 }
 0x1a1   :  { %v495_v10 = vpack.c.bf16 %v1858_v7, %v1855_v1 }
 0x1a3   :  { %v1859_v14 = vpop.f32.mrb[24].mxu0  ;;  %2116 = vmatmul.mubr.msk.bf16.gmra.mrb[72].mxu0 %vm538_vm0, %v495_v10 }
 0x1a4   :  { %v1860_v13 = vpop.f32.mrb[25].mxu0 }
 0x1a5   :  { %v1861_v63 = vadd.f32 %v1860_v13, %v1859_v14  ;;  %v1862_v15 = vpop.f32.mrb[26].mxu0 }
 0x1a6   :  { %v1863_v16 = vpop.f32.mrb[27].mxu0 }
 0x1a7   :  { %v1864_v19 = vadd.f32 %v1863_v16, %v1862_v15 }
 0x1a9   :  { %v496_v3 = vpack.c.bf16 %v1864_v19, %v1861_v63 }
 0x1ab   :  { %v1865_v20 = vpop.f32.mrb[28].mxu0  ;;  %2119 = vmatprep.mubr.msk.bf16.mxu0 %vm538_vm0, %v496_v3 }
 0x1ac   :  { %v1866_v17 = vpop.f32.mrb[29].mxu0 }
 0x1ad   :  { %v1867_v2 = vadd.f32 %v1866_v17, %v1865_v20  ;;  %v1868_v57 = vpop.f32.mrb[30].mxu0 }
 0x1ae   :  { %v1869_v6 = vpop.f32.mrb[31].mxu0 }
 0x1af   :  { %v1870_v4 = vadd.f32 %v1869_v6, %v1868_v57  ;;  %v2297_v57 = vld [vmem:[#allocation10 + $0x8] sm:$0xff]  }
 0x1b1   :  { %v497_v60 = vpack.c.bf16 %v1870_v4, %v1867_v2 }
 0x1b3   :  { %v1871_v8 = vpop.f32.mrb[32].mxu0  ;;  %2120 = vmatmul.mubr.msk.bf16.gmra.mrb[76].mxu0 %vm538_vm0, %v497_v60 }
 0x1b4   :  { %v1872_v1 = vpop.f32.mrb[33].mxu0 }
 0x1b5   :  { %v1873_v9 = vadd.f32 %v1872_v1, %v1871_v8  ;;  %v1874_v7 = vpop.f32.mrb[34].mxu0  ;;  %v2298_v8 = vld [vmem:[#allocation10 + $0x10] sm:$0xff]  }
 0x1b6   :  { %v1875_v10 = vpop.f32.mrb[35].mxu0 }
 0x1b7   :  { %v1876_v14 = vadd.f32 %v1875_v10, %v1874_v7  ;;  %v2299_v10 = vld [vmem:[#allocation10 + $0x18] sm:$0xff]  }
 0x1b9   :  { %v498_v13 = vpack.c.bf16 %v1876_v14, %v1873_v9 }
 0x1bb   :  { %v1877_v15 = vpop.f32.mrb[36].mxu0  ;;  %2123 = vmatprep.mubr.msk.bf16.mxu1 %vm538_vm0, %v498_v13 }
 0x1bc   :  { %v1878_v63 = vpop.f32.mrb[37].mxu0 }
 0x1bd   :  { %v1879_v16 = vadd.f32 %v1878_v63, %v1877_v15  ;;  %v1880_v19 = vpop.f32.mrb[38].mxu0 }
 0x1be   :  { %v1881_v3 = vpop.f32.mrb[39].mxu0 }
 0x1bf   :  { %v1882_v20 = vadd.f32 %v1881_v3, %v1880_v19 }
 0x1c1   :  { %v499_v17 = vpack.c.bf16 %v1882_v20, %v1879_v16  ;;  %v2300_v16 = vld [vmem:[#allocation10 + $0x20] sm:$0xff]   ;;  %v2301_v20 = vld [vmem:[#allocation10 + $0x28] sm:$0xff]  }
 0x1c3   :  { %v1883_v2 = vpop.f32.mrb[40].mxu0  ;;  %2124 = vmatmul.mubr.msk.bf16.vlgmr.msra.gmra.mrb[0].mxu1 %vm538_vm0, %v499_v17 }
 0x1c4   :  { %v1884_v6 = vpop.f32.mrb[41].mxu0  ;;  %2140 = vmatpush3.bf16.msra.mxu1 %v2787_v5 }
 0x1c5   :  { %v1885_v4 = vadd.f32 %v1884_v6, %v1883_v2  ;;  %v1886_v60 = vpop.f32.mrb[42].mxu0  ;;  %2141 = vmatprep.subr.bf16.mxu1 %v2297_v57 }
 0x1c6   :  { %v1887_v1 = vpop.f32.mrb[43].mxu0 }
 0x1c7   :  { %v1888_v9 = vadd.f32 %v1887_v1, %v1886_v60 }
 0x1c8   :  { %2142 = vmatpush3.bf16.msra.mxu1 %v2297_v57 }
 0x1c9   :  { %v500_v7 = vpack.c.bf16 %v1888_v9, %v1885_v4  ;;  %2143 = vmatprep.subr.bf16.mxu1 %v2298_v8 }
 0x1cb   :  { %v1889_v14 = vpop.f32.mrb[44].mxu0  ;;  %2127 = vmatprep.mubr.msk.bf16.mxu1 %vm538_vm0, %v500_v7  ;;  %v2303_v7 = vld [vmem:[#allocation10 + $0x38] sm:$0xff]  }
 0x1cc   :  { %v1890_v13 = vpop.f32.mrb[45].mxu0  ;;  %2144 = vmatpush3.bf16.msra.mxu1 %v2298_v8  ;;  %v2302_v8 = vld [vmem:[#allocation10 + $0x30] sm:$0xff]  }
 0x1cd   :  { %v1891_v15 = vadd.f32 %v1890_v13, %v1889_v14  ;;  %v1892_v63 = vpop.f32.mrb[46].mxu0  ;;  %2145 = vmatprep.subr.bf16.mxu1 %v2299_v10 }
 0x1ce   :  { %v1893_v5 = vpop.f32.mrb[47].mxu0 }
 0x1cf   :  { %v1894_v19 = vadd.f32 %v1893_v5, %v1892_v63 }
 0x1d0   :  { %2146 = vmatpush3.bf16.msra.mxu1 %v2299_v10 }
 0x1d1   :  { %v501_v3 = vpack.c.bf16 %v1894_v19, %v1891_v15  ;;  %2147 = vmatprep.subr.bf16.mxu1 %v2300_v16 }
 0x1d3   :  { %v1895_v17 = vpop.f32.mrb[48].mxu0  ;;  %2128 = vmatmul.mubr.msk.bf16.gmra.mrb[4].mxu1 %vm538_vm0, %v501_v3 }
 0x1d4   :  { %v1896_v57 = vpop.f32.mrb[49].mxu0  ;;  %2148 = vmatpush3.bf16.msra.mxu1 %v2300_v16 }
 0x1d5   :  { %v1897_v2 = vadd.f32 %v1896_v57, %v1895_v17  ;;  %v1898_v6 = vpop.f32.mrb[50].mxu0  ;;  %2149 = vmatprep.subr.bf16.mxu1 %v2301_v20 }
 0x1d6   :  { %v1899_v4 = vpop.f32.mrb[51].mxu0 }
 0x1d7   :  { %v1900_v60 = vadd.f32 %v1899_v4, %v1898_v6 }
 0x1d8   :  { %2150 = vmatpush3.bf16.msra.mxu1 %v2301_v20 }
 0x1d9   :  { %v502_v1 = vpack.c.bf16 %v1900_v60, %v1897_v2  ;;  %2151 = vmatprep.subr.bf16.mxu1 %v2302_v8 }
 0x1db   :  { %v1901_v9 = vpop.f32.mrb[52].mxu0  ;;  %2131 = vmatprep.mubr.msk.bf16.mxu1 %vm538_vm0, %v502_v1 }
 0x1dc   :  { %v1902_v10 = vpop.f32.mrb[53].mxu0  ;;  %2152 = vmatpush3.bf16.msra.mxu1 %v2302_v8 }
 0x1dd   :  { %v1903_v14 = vadd.f32 %v1902_v10, %v1901_v9  ;;  %v1904_v13 = vpop.f32.mrb[54].mxu0  ;;  %2153 = vmatprep.subr.bf16.mxu1 %v2303_v7 }
 0x1de   :  { %v1905_v15 = vpop.f32.mrb[55].mxu0 }
 0x1df   :  { %v1906_v63 = vadd.f32 %v1905_v15, %v1904_v13 }
 0x1e0   :  { %2154 = vmatpush3.bf16.msra.mxu1 %v2303_v7  ;;  %v2807_v7 = vpop.permute.xlu1 %760 }
 0x1e1   :  { %v503_v16 = vpack.c.bf16 %v1906_v63, %v1903_v14  ;;  %v2809_v14 = vpop.permute.xlu0 %750 }
 0x1e3   :  { %v1907_v5 = vpop.f32.mrb[56].mxu0  ;;  %2132 = vmatmul.mubr.msk.bf16.gmra.mrb[8].mxu1 %vm538_vm0, %v503_v16 }
 0x1e4   :  { %v1908_v19 = vpop.f32.mrb[57].mxu0  ;;  %v2812_v16 = vpop.permute.xlu1 %765 }
 0x1e5   :  { %v1909_v3 = vadd.f32 %v1908_v19, %v1907_v5  ;;  %v1910_v20 = vpop.f32.mrb[58].mxu0 }
 0x1e6   :  { %v1911_v17 = vpop.f32.mrb[59].mxu0 }
 0x1e7   :  { %v1912_v57 = vadd.f32 %v1911_v17, %v1910_v20 }
 0x1e9   :  { %v504_v2 = vpack.c.bf16 %v1912_v57, %v1909_v3  ;;  %v2815_v3 = vpop.permute.xlu0 %755 }
 0x1eb   :  { %v1913_v6 = vpop.f32.mrb[60].mxu0  ;;  %2135 = vmatprep.mubr.msk.bf16.mxu1 %vm538_vm0, %v504_v2 }
 0x1ec   :  { %v1914_v4 = vpop.f32.mrb[61].mxu0 }
 0x1ed   :  { %v1915_v60 = vadd.f32 %v1914_v4, %v1913_v6  ;;  %v1916_v8 = vpop.f32.mrb[62].mxu0 }
 0x1ee   :  { %v1917_v1 = vpop.f32.mrb[63].mxu0 }
 0x1ef   :  { %v1918_v9 = vadd.f32 %v1917_v1, %v1916_v8 }
 0x1f1   :  { %v505_v10 = vpack.c.bf16 %v1918_v9, %v1915_v60  ;;  %v2819_v9 = vpop.permute.xlu0 %770 }
 0x1f3   :  { %2136 = vmatmul.mubr.msk.bf16.gmra.mrb[12].mxu1 %vm538_vm0, %v505_v10  ;;  %v2821_v10 = vpop.permute.xlu1 %775 }
 0x1f7   :  { %v2826_v59 = vpop.permute.xlu1 %785 }
 0x256   :  { %v2109_v13 = vpop.f32.mrb[64].mxu0 }
 0x257   :  { %v910_v15 = vmul.f32 %v2109_v13, %v2807_v7  ;;  %v621_v63 = vpop.f32.mrb[65].mxu0  ;;  %v2823_v13 = vpop.permute.xlu0 %780 }
 0x258   :  { %v908_v5 = vmul.f32 %v2809_v14, %v621_v63  ;;  %v2110_v19 = vpop.f32.mrb[66].mxu0 }
 0x259   :  { %v911_v20 = vmul.f32 %v2110_v19, %v2812_v16  ;;  %v624_v17 = vpop.f32.mrb[67].mxu0  ;;  %v942_v2 = vmax.f32 %v910_v15, 0.0 }
 0x25a   :  { %v909_v57 = vmul.f32 %v2815_v3, %v624_v17  ;;  %v940_v4 = vmax.f32 %v908_v5, 0.0 }
 0x25b   :  { %v943_v6 = vmax.f32 %v911_v20, 0.0  ;;  %v2831_v58 = vpop.permute.xlu0 %790 }
 0x25c   :  { %v941_v60 = vmax.f32 %v909_v57, 0.0 }
 0x25d   :  { %v973_v8 = vpack.c.bf16 %v943_v6, %v942_v2 }
 0x25e   :  { %v972_v1 = vpack.c.bf16 %v941_v60, %v940_v4 }
 0x25f   :  { %v2835_v55 = vpop.permute.xlu0 %800 }
 0x260   :  { %2155 = vmatprep.mubr.bf16.mxu1 %v972_v1 }
 0x261   :  { %2156 = vmatmul.mubr.bf16.vlgmr.msra.gmra.mrb[16].mxu1 %v973_v8 }
 0x263   :  { %v2843_v51 = vpop.permute.xlu0 %810 }
 0x266   :  { %v2113_v63 = vpop.f32.mrb[68].mxu0 }
 0x267   :  { %v914_v19 = vmul.f32 %v2113_v63, %v2823_v13  ;;  %v637_v62 = vpop.f32.mrb[69].mxu0  ;;  %v2833_v63 = vpop.permute.xlu1 %795 }
 0x268   :  { %v912_v15 = vmul.f32 %v2819_v9, %v637_v62  ;;  %v2114_v5 = vpop.f32.mrb[70].mxu0  ;;  %v2847_v49 = vpop.permute.xlu0 %820 }
 0x269   :  { %v915_v20 = vmul.f32 %v2114_v5, %v2826_v59  ;;  %v640_v17 = vpop.f32.mrb[71].mxu0  ;;  %v946_v2 = vmax.f32 %v914_v19, 0.0 }
 0x26a   :  { %v913_v57 = vmul.f32 %v2821_v10, %v640_v17  ;;  %v944_v4 = vmax.f32 %v912_v15, 0.0 }
 0x26b   :  { %v947_v6 = vmax.f32 %v915_v20, 0.0  ;;  %v2838_v52 = vpop.permute.xlu1 %805 }
 0x26c   :  { %v945_v60 = vmax.f32 %v913_v57, 0.0  ;;  %v2855_v45 = vpop.permute.xlu0 %830 }
 0x26d   :  { %v975_v8 = vpack.c.bf16 %v947_v6, %v946_v2 }
 0x26e   :  { %v974_v1 = vpack.c.bf16 %v945_v60, %v944_v4 }
 0x270   :  { %2159 = vmatprep.mubr.bf16.mxu1 %v974_v1  ;;  %v2859_v43 = vpop.permute.xlu0 %840 }
 0x271   :  { %2160 = vmatmul.mubr.bf16.gmra.mrb[20].mxu1 %v975_v8 }
 0x274   :  { %v2867_v39 = vpop.permute.xlu0 %850 }
 0x276   :  { %v2117_v62 = vpop.f32.mrb[72].mxu0 }
 0x277   :  { %v918_v5 = vmul.f32 %v2117_v62, %v2835_v55  ;;  %v653_v54 = vpop.f32.mrb[73].mxu0  ;;  %v2845_v62 = vpop.permute.xlu1 %815 }
 0x278   :  { %v916_v19 = vmul.f32 %v2831_v58, %v653_v54  ;;  %v2118_v15 = vpop.f32.mrb[74].mxu0  ;;  %v2871_v37 = vpop.permute.xlu0 %860 }
 0x279   :  { %v919_v20 = vmul.f32 %v2118_v15, %v2838_v52  ;;  %v656_v17 = vpop.f32.mrb[75].mxu0  ;;  %v950_v2 = vmax.f32 %v918_v5, 0.0 }
 0x27a   :  { %v917_v57 = vmul.f32 %v2833_v63, %v656_v17  ;;  %v948_v4 = vmax.f32 %v916_v19, 0.0 }
 0x27b   :  { %v951_v6 = vmax.f32 %v919_v20, 0.0  ;;  %v2850_v46 = vpop.permute.xlu1 %825 }
 0x27c   :  { %v949_v60 = vmax.f32 %v917_v57, 0.0  ;;  %v2879_v33 = vpop.permute.xlu0 %870 }
 0x27d   :  { %v977_v8 = vpack.c.bf16 %v951_v6, %v950_v2  ;;  %3097 = vst [vmem:[#allocation21_spill] sm:$0xff] %v2879_v33 }
 0x27e   :  { %v976_v1 = vpack.c.bf16 %v949_v60, %v948_v4 }
 0x280   :  { %2163 = vmatprep.mubr.bf16.mxu1 %v976_v1  ;;  %v2883_v31 = vpop.permute.xlu0 %880 }
 0x281   :  { %2164 = vmatmul.mubr.bf16.gmra.mrb[24].mxu1 %v977_v8  ;;  %3099 = vst [vmem:[#allocation23_spill] sm:$0xff] %v2883_v31 }
 0x284   :  { %v2891_v27 = vpop.permute.xlu0 %890 }
 0x285   :  { %3101 = vst [vmem:[#allocation25_spill] sm:$0xff] %v2891_v27 }
 0x286   :  { %v2121_v54 = vpop.f32.mrb[76].mxu0 }
 0x287   :  { %v922_v15 = vmul.f32 %v2121_v54, %v2847_v49  ;;  %v669_v48 = vpop.f32.mrb[77].mxu0  ;;  %v2857_v54 = vpop.permute.xlu1 %835 }
 0x288   :  { %v920_v5 = vmul.f32 %v2843_v51, %v669_v48  ;;  %v2122_v19 = vpop.f32.mrb[78].mxu0  ;;  %v2895_v25 = vpop.permute.xlu0 %900 }
 0x289   :  { %v923_v20 = vmul.f32 %v2122_v19, %v2850_v46  ;;  %v672_v17 = vpop.f32.mrb[79].mxu0  ;;  %v954_v2 = vmax.f32 %v922_v15, 0.0  ;;  %3103 = vst [vmem:[#allocation27_spill] sm:$0xff] %v2895_v25 }
 0x28a   :  { %v921_v57 = vmul.f32 %v2845_v62, %v672_v17  ;;  %v952_v4 = vmax.f32 %v920_v5, 0.0 }
 0x28b   :  { %v955_v6 = vmax.f32 %v923_v20, 0.0  ;;  %v2862_v40 = vpop.permute.xlu1 %845 }
 0x28c   :  { %v953_v60 = vmax.f32 %v921_v57, 0.0 }
 0x28d   :  { %v979_v8 = vpack.c.bf16 %v955_v6, %v954_v2 }
 0x28e   :  { %v978_v1 = vpack.c.bf16 %v953_v60, %v952_v4 }
 0x290   :  { %2167 = vmatprep.mubr.bf16.mxu1 %v978_v1 }
 0x291   :  { %2168 = vmatmul.mubr.bf16.gmra.mrb[28].mxu1 %v979_v8 }
 0x296   :  { %v2125_v48 = vpop.f32.mrb[0].mxu1 }
 0x297   :  { %v926_v19 = vmul.f32 %v2125_v48, %v2859_v43  ;;  %v685_v42 = vpop.f32.mrb[1].mxu1  ;;  %v2869_v48 = vpop.permute.xlu1 %855 }
 0x298   :  { %v924_v15 = vmul.f32 %v2855_v45, %v685_v42  ;;  %v2126_v5 = vpop.f32.mrb[2].mxu1 }
 0x299   :  { %v927_v20 = vmul.f32 %v2126_v5, %v2862_v40  ;;  %v688_v17 = vpop.f32.mrb[3].mxu1  ;;  %v958_v2 = vmax.f32 %v926_v19, 0.0 }
 0x29a   :  { %v925_v57 = vmul.f32 %v2857_v54, %v688_v17  ;;  %v956_v4 = vmax.f32 %v924_v15, 0.0 }
 0x29b   :  { %v959_v6 = vmax.f32 %v927_v20, 0.0  ;;  %v2874_v34 = vpop.permute.xlu1 %865 }
 0x29c   :  { %v957_v60 = vmax.f32 %v925_v57, 0.0  ;;  %3096 = vst [vmem:[#allocation20_spill] sm:$0xff] %v2874_v34 }
 0x29d   :  { %v981_v8 = vpack.c.bf16 %v959_v6, %v958_v2 }
 0x29e   :  { %v980_v1 = vpack.c.bf16 %v957_v60, %v956_v4 }
 0x2a0   :  { %2171 = vmatprep.mubr.bf16.mxu1 %v980_v1 }
 0x2a1   :  { %2172 = vmatmul.mubr.bf16.gmra.mrb[32].mxu1 %v981_v8 }
 0x2a6   :  { %v2129_v42 = vpop.f32.mrb[4].mxu1 }
 0x2a7   :  { %v930_v5 = vmul.f32 %v2129_v42, %v2871_v37  ;;  %v701_v36 = vpop.f32.mrb[5].mxu1  ;;  %v2881_v42 = vpop.permute.xlu1 %875 }
 0x2a8   :  { %v928_v19 = vmul.f32 %v2867_v39, %v701_v36  ;;  %v2130_v15 = vpop.f32.mrb[6].mxu1  ;;  %3098 = vst [vmem:[#allocation22_spill] sm:$0xff] %v2881_v42 }
 0x2a9   :  { %v931_v20 = vmul.f32 %v2130_v15, %v2874_v34  ;;  %v704_v17 = vpop.f32.mrb[7].mxu1  ;;  %v962_v2 = vmax.f32 %v930_v5, 0.0 }
 0x2aa   :  { %v929_v57 = vmul.f32 %v2869_v48, %v704_v17  ;;  %v960_v4 = vmax.f32 %v928_v19, 0.0 }
 0x2ab   :  { %v963_v6 = vmax.f32 %v931_v20, 0.0  ;;  %v2886_v28 = vpop.permute.xlu1 %885 }
 0x2ac   :  { %v961_v60 = vmax.f32 %v929_v57, 0.0  ;;  %3100 = vst [vmem:[#allocation24_spill] sm:$0xff] %v2886_v28 }
 0x2ad   :  { %v983_v8 = vpack.c.bf16 %v963_v6, %v962_v2 }
 0x2ae   :  { %v982_v1 = vpack.c.bf16 %v961_v60, %v960_v4 }
 0x2b0   :  { %2175 = vmatprep.mubr.bf16.mxu1 %v982_v1 }
 0x2b1   :  { %2176 = vmatmul.mubr.bf16.gmra.mrb[36].mxu1 %v983_v8 }
 0x2b6   :  { %v2133_v36 = vpop.f32.mrb[8].mxu1 }
 0x2b7   :  { %v934_v15 = vmul.f32 %v2133_v36, %v2883_v31  ;;  %v717_v30 = vpop.f32.mrb[9].mxu1  ;;  %v2893_v36 = vpop.permute.xlu1 %895 }
 0x2b8   :  { %v932_v5 = vmul.f32 %v2879_v33, %v717_v30  ;;  %v2134_v19 = vpop.f32.mrb[10].mxu1  ;;  %3102 = vst [vmem:[#allocation26_spill] sm:$0xff] %v2893_v36 }
 0x2b9   :  { %v935_v20 = vmul.f32 %v2134_v19, %v2886_v28  ;;  %v720_v17 = vpop.f32.mrb[11].mxu1  ;;  %v966_v2 = vmax.f32 %v934_v15, 0.0 }
 0x2ba   :  { %v933_v57 = vmul.f32 %v2881_v42, %v720_v17  ;;  %v964_v4 = vmax.f32 %v932_v5, 0.0 }
 0x2bb   :  { %v967_v6 = vmax.f32 %v935_v20, 0.0  ;;  %v2898_v22 = vpop.permute.xlu1 %905 }
 0x2bc   :  { %v965_v60 = vmax.f32 %v933_v57, 0.0  ;;  %3104 = vst [vmem:[#allocation28_spill] sm:$0xff] %v2898_v22 }
 0x2bd   :  { %v985_v8 = vpack.c.bf16 %v967_v6, %v966_v2 }
 0x2be   :  { %v984_v1 = vpack.c.bf16 %v965_v60, %v964_v4 }
 0x2c0   :  { %2179 = vmatprep.mubr.bf16.mxu1 %v984_v1 }
 0x2c1   :  { %2180 = vmatmul.mubr.bf16.gmra.mrb[40].mxu1 %v985_v8 }
 0x2c6   :  { %v2137_v30 = vpop.f32.mrb[12].mxu1 }
 0x2c7   :  { %v938_v19 = vmul.f32 %v2137_v30, %v2895_v25  ;;  %v733_v24 = vpop.f32.mrb[13].mxu1 }
 0x2c8   :  { %v936_v15 = vmul.f32 %v2891_v27, %v733_v24  ;;  %v2138_v5 = vpop.f32.mrb[14].mxu1 }
 0x2c9   :  { %v939_v20 = vmul.f32 %v2138_v5, %v2898_v22  ;;  %v736_v17 = vpop.f32.mrb[15].mxu1  ;;  %v970_v2 = vmax.f32 %v938_v19, 0.0 }
 0x2ca   :  { %v937_v57 = vmul.f32 %v2893_v36, %v736_v17  ;;  %v968_v4 = vmax.f32 %v936_v15, 0.0 }
 0x2cb   :  { %v971_v6 = vmax.f32 %v939_v20, 0.0 }
 0x2cc   :  { %v969_v60 = vmax.f32 %v937_v57, 0.0 }
 0x2cd   :  { %v987_v8 = vpack.c.bf16 %v971_v6, %v970_v2 }
 0x2ce   :  { %v986_v1 = vpack.c.bf16 %v969_v60, %v968_v4 }
 0x2d0   :  { %2183 = vmatprep.mubr.bf16.mxu1 %v986_v1 }
 0x2d1   :  { %2184 = vmatmul.mubr.bf16.gmra.mrb[44].mxu1 %v987_v8 }
 0x2d2   :  { %1261 = vmatprep.mubr.bf16.mxu1 %v138_v12 }
 0x334   :  { %v2157_v30 = vpop.f32.mrb[16].mxu1 }
 0x335   :  { %v1086_v21 = vpop.f32.mrb[17].mxu1 }
 0x336   :  { %v2158_v24 = vpop.f32.mrb[18].mxu1 }
 0x337   :  { %v1214_v25 = vpack.c.bf16 %v2158_v24, %v2157_v30  ;;  %v1089_v27 = vpop.f32.mrb[19].mxu1 }
 0x338   :  { %v1213_v5 = vpack.c.bf16 %v1089_v27, %v1086_v21 }
 0x344   :  { %v2161_v22 = vpop.f32.mrb[20].mxu1 }
 0x345   :  { %v1102_v28 = vpop.f32.mrb[21].mxu1 }
 0x346   :  { %v2162_v17 = vpop.f32.mrb[22].mxu1 }
 0x347   :  { %v1216_v19 = vpack.c.bf16 %v2162_v17, %v2161_v22  ;;  %v1105_v20 = vpop.f32.mrb[23].mxu1 }
 0x348   :  { %v1215_v15 = vpack.c.bf16 %v1105_v20, %v1102_v28 }
 0x354   :  { %v2165_v57 = vpop.f32.mrb[24].mxu1 }
 0x355   :  { %v1118_v2 = vpop.f32.mrb[25].mxu1 }
 0x356   :  { %v2166_v6 = vpop.f32.mrb[26].mxu1 }
 0x357   :  { %v1218_v4 = vpack.c.bf16 %v2166_v6, %v2165_v57  ;;  %v1121_v60 = vpop.f32.mrb[27].mxu1 }
 0x358   :  { %v1217_v8 = vpack.c.bf16 %v1121_v60, %v1118_v2 }
 0x364   :  { %v2169_v1 = vpop.f32.mrb[28].mxu1 }
 0x365   :  { %v1134_v12 = vpop.f32.mrb[29].mxu1 }
 0x366   :  { %v2170_v36 = vpop.f32.mrb[30].mxu1 }
 0x367   :  { %v1220_v31 = vpack.c.bf16 %v2170_v36, %v2169_v1  ;;  %v1137_v42 = vpop.f32.mrb[31].mxu1 }
 0x368   :  { %v1219_v30 = vpack.c.bf16 %v1137_v42, %v1134_v12 }
 0x374   :  { %v2173_v24 = vpop.f32.mrb[32].mxu1 }
 0x375   :  { %v1150_v21 = vpop.f32.mrb[33].mxu1 }
 0x376   :  { %v2174_v27 = vpop.f32.mrb[34].mxu1 }
 0x377   :  { %v1222_v33 = vpack.c.bf16 %v2174_v27, %v2173_v24  ;;  %v1153_v34 = vpop.f32.mrb[35].mxu1 }
 0x378   :  { %v1221_v22 = vpack.c.bf16 %v1153_v34, %v1150_v21 }
 0x37a   :  { %1963 = vmatprep.subr.bf16.mxu1 %v1221_v22  ;;  %v2305_v22 = vld [vmem:[#allocation11 + $0x8] sm:$0xff]  }
 0x37b   :  { %1964 = vmatpush3.bf16.msra.mxu1 %v1213_v5 }
 0x37c   :  { %1965 = vmatprep.subr.bf16.mxu1 %v1222_v33 }
 0x37f   :  { %1966 = vmatpush3.bf16.msra.mxu1 %v1214_v25 }
 0x384   :  { %v2177_v28 = vpop.f32.mrb[36].mxu1 }
 0x385   :  { %v1166_v17 = vpop.f32.mrb[37].mxu1 }
 0x386   :  { %v2178_v20 = vpop.f32.mrb[38].mxu1 }
 0x387   :  { %v1224_v57 = vpack.c.bf16 %v2178_v20, %v2177_v28  ;;  %v1169_v2 = vpop.f32.mrb[39].mxu1  ;;  %v3108_v28 = vunpack.c.l.s8.bf16 %v2672_v23  ;;  %v3112_v20 = vunpack.c.l.s8.bf16 %v2688_v29 }
 0x388   :  { %v1223_v6 = vpack.c.bf16 %v1169_v2, %v1166_v17  ;;  %v3110_v17 = vunpack.c.h.s8.bf16 %v2672_v23  ;;  %v3115_v2 = vunpack.c.h.s8.bf16 %v2696_v32  ;;  %v3117_v23 = vunpack.c.l.s8.bf16 %v2712_v38 }
 0x38a   :  { %1967 = vmatprep.subr.bf16.mxu1 %v1223_v6  ;;  %v3116_v6 = vunpack.c.l.s8.bf16 %v2704_v35 }
 0x38b   :  { %1968 = vmatpush3.bf16.msra.mxu1 %v1215_v15  ;;  %v2304_v15 = vld [vmem:[#allocation11] sm:$0xff]  }
 0x38c   :  { %1969 = vmatprep.subr.bf16.mxu1 %v1224_v57  ;;  %2187 = vmatprep.subr.bf16.mxu0 %v2304_v15  ;;  %v3113_v57 = vunpack.c.l.s8.bf16 %v2696_v32  ;;  %v3122_v32 = vunpack.c.h.s8.bf16 %v2720_v41 }
 0x38d   :  { %2188 = vmatpush3.bf16.msra.mxu0 %v2304_v15 }
 0x38e   :  { %2189 = vmatprep.subr.bf16.mxu0 %v2305_v22 }
 0x38f   :  { %1970 = vmatpush3.bf16.msra.mxu1 %v1216_v19  ;;  %v2306_v19 = vld [vmem:[#allocation11 + $0x10] sm:$0xff]  }
 0x391   :  { %2190 = vmatpush3.bf16.msra.mxu0 %v2305_v22 }
 0x392   :  { %2191 = vmatprep.subr.bf16.mxu0 %v2306_v19 }
 0x394   :  { %v2181_v42 = vpop.f32.mrb[40].mxu1 }
 0x395   :  { %v1182_v36 = vpop.f32.mrb[41].mxu1  ;;  %2192 = vmatpush3.bf16.msra.mxu0 %v2306_v19 }
 0x396   :  { %v2182_v60 = vpop.f32.mrb[42].mxu1 }
 0x397   :  { %v1226_v1 = vpack.c.bf16 %v2182_v60, %v2181_v42  ;;  %v1185_v12 = vpop.f32.mrb[43].mxu1  ;;  %v3119_v42 = vunpack.c.h.s8.bf16 %v2712_v38  ;;  %v3123_v60 = vunpack.c.h.s8.bf16 %v2728_v44  ;;  %v3126_v38 = vunpack.c.h.s8.bf16 %v2736_v47 }
 0x398   :  { %v1225_v34 = vpack.c.bf16 %v1185_v12, %v1182_v36  ;;  %v3120_v36 = vunpack.c.l.s8.bf16 %v2720_v41  ;;  %v2307_v12 = vld [vmem:[#allocation11 + $0x18] sm:$0xff]   ;;  %v3127_v41 = vunpack.c.h.s8.bf16 %v2744_v50 }
 0x399   :  { %2193 = vmatprep.subr.bf16.mxu0 %v2307_v12 }
 0x39a   :  { %1971 = vmatprep.subr.bf16.mxu1 %v1225_v34  ;;  %2194 = vmatpush3.bf16.msra.mxu0 %v2307_v12  ;;  %v2308_v34 = vld [vmem:[#allocation11 + $0x20] sm:$0xff]  }
 0x39b   :  { %1972 = vmatpush3.bf16.msra.mxu1 %v1217_v8  ;;  %v3106_v8 = vunpack.c.h.s8.bf16 %v2659_v11  ;;  %v3111_v11 = vunpack.c.h.s8.bf16 %v2680_v26  ;;  %2195 = vmatprep.subr.bf16.mxu0 %v2308_v34 }
 0x39c   :  { %1973 = vmatprep.subr.bf16.mxu1 %v1226_v1  ;;  %v3124_v1 = vunpack.c.l.s8.bf16 %v2736_v47  ;;  %v2310_v47 = vld [vmem:[#allocation11 + $0x30] sm:$0xff]  }
 0x39e   :  { %2196 = vmatpush3.bf16.msra.mxu0 %v2308_v34 }
 0x39f   :  { %1974 = vmatpush3.bf16.msra.mxu1 %v1218_v4  ;;  %v3105_v4 = vunpack.c.l.s8.bf16 %v2664_v18 }
 0x3a4   :  { %v2185_v25 = vpop.f32.mrb[44].mxu1 }
 0x3a5   :  { %v1198_v33 = vpop.f32.mrb[45].mxu1 }
 0x3a6   :  { %v2186_v5 = vpop.f32.mrb[46].mxu1 }
 0x3a7   :  { %v1228_v24 = vpack.c.bf16 %v2186_v5, %v2185_v25  ;;  %v1201_v21 = vpop.f32.mrb[47].mxu1  ;;  %v2309_v25 = vld [vmem:[#allocation11 + $0x28] sm:$0xff]   ;;  %v2311_v5 = vld [vmem:[#allocation11 + $0x38] sm:$0xff]  }
 0x3a8   :  { %v1227_v27 = vpack.c.bf16 %v1201_v21, %v1198_v33  ;;  %2197 = vmatprep.subr.bf16.mxu0 %v2309_v25  ;;  %v3129_v33 = vunpack.c.l.s8.bf16 %v2760_v56  ;;  %v3132_v21 = vunpack.c.l.s8.bf16 %v2768_v61 }
 0x3a9   :  { %2198 = vmatpush3.bf16.msra.mxu0 %v2309_v25 }
 0x3aa   :  { %1975 = vmatprep.subr.bf16.mxu1 %v1227_v27  ;;  %2199 = vmatprep.subr.bf16.mxu0 %v2310_v47  ;;  %v3133_v27 = vunpack.c.l.s8.bf16 %v2776_v0 }
 0x3ab   :  { %1976 = vmatpush3.bf16.msra.mxu1 %v1219_v30  ;;  %v3107_v30 = vunpack.c.h.s8.bf16 %v2664_v18  ;;  %v3114_v18 = vunpack.c.h.s8.bf16 %v2688_v29  ;;  %v3121_v29 = vunpack.c.l.s8.bf16 %v2728_v44  ;;  %v3128_v44 = vunpack.c.l.s8.bf16 %v2752_v53 }
 0x3ac   :  { %1977 = vmatprep.subr.bf16.mxu1 %v1228_v24  ;;  %v3131_v24 = vunpack.c.h.s8.bf16 %v2760_v56 }
 0x3ad   :  { %2200 = vmatpush3.bf16.msra.mxu0 %v2310_v47 }
 0x3ae   :  { %2201 = vmatprep.subr.bf16.mxu0 %v2311_v5 }
 0x3af   :  { %1978 = vmatpush3.bf16.msra.mxu1 %v1220_v31  ;;  %v3109_v31 = vunpack.c.l.s8.bf16 %v2680_v26  ;;  %v3118_v26 = vunpack.c.h.s8.bf16 %v2704_v35  ;;  %v3125_v35 = vunpack.c.l.s8.bf16 %v2744_v50  ;;  %v3130_v50 = vunpack.c.h.s8.bf16 %v2752_v53 }
 0x3b0   :  { %2243 = vmatprep.subr.bf16.mxu1 %v2304_v15  ;;  %v3135_v53 = vunpack.c.h.s8.bf16 %v2776_v0 }
 0x3b1   :  { %2202 = vmatpush3.bf16.msra.mxu0 %v2311_v5 }
 0x3b2   :  { %1262 = vmatmul.mubr.bf16.vlgmr.msra.gmra.mrb[48].mxu1 %v3105_v4 }
 0x3b3   :  { %1269 = vmatprep.mubr.bf16.mxu1 %v3106_v8  ;;  %2251 = vmatpush3.bf16.msra.mxu1 %v2304_v15  ;;  %v3134_v15 = vunpack.c.h.s8.bf16 %v2768_v61 }
 0x3b4   :  { %2244 = vmatprep.subr.bf16.mxu1 %v2305_v22 }
 0x3b7   :  { %2252 = vmatpush3.bf16.msra.mxu1 %v2305_v22 }
 0x3b8   :  { %2245 = vmatprep.subr.bf16.mxu1 %v2306_v19 }
 0x3ba   :  { %1270 = vmatmul.mubr.bf16.gmra.mrb[52].mxu1 %v3107_v30 }
 0x3bb   :  { %1277 = vmatprep.mubr.bf16.mxu1 %v3108_v28  ;;  %2253 = vmatpush3.bf16.msra.mxu1 %v2306_v19 }
 0x3bc   :  { %2246 = vmatprep.subr.bf16.mxu1 %v2307_v12 }
 0x3bf   :  { %2254 = vmatpush3.bf16.msra.mxu1 %v2307_v12 }
 0x3c0   :  { %2247 = vmatprep.subr.bf16.mxu1 %v2308_v34 }
 0x3c2   :  { %1278 = vmatmul.mubr.bf16.gmra.mrb[56].mxu1 %v3109_v31 }
 0x3c3   :  { %1285 = vmatprep.mubr.bf16.mxu1 %v3110_v17  ;;  %2255 = vmatpush3.bf16.msra.mxu1 %v2308_v34 }
 0x3c4   :  { %2248 = vmatprep.subr.bf16.mxu1 %v2309_v25 }
 0x3c7   :  { %2256 = vmatpush3.bf16.msra.mxu1 %v2309_v25 }
 0x3c8   :  { %2249 = vmatprep.subr.bf16.mxu1 %v2310_v47 }
 0x3ca   :  { %1286 = vmatmul.mubr.bf16.gmra.mrb[60].mxu1 %v3111_v11 }
 0x3cb   :  { %1293 = vmatprep.mubr.bf16.mxu1 %v3112_v20  ;;  %2257 = vmatpush3.bf16.msra.mxu1 %v2310_v47 }
 0x3cc   :  { %2250 = vmatprep.subr.bf16.mxu1 %v2311_v5 }
 0x3cf   :  { %2258 = vmatpush3.bf16.msra.mxu1 %v2311_v5 }
 0x3d2   :  { %1294 = vmatmul.mubr.bf16.gmra.mrb[64].mxu1 %v3113_v57 }
 0x3d3   :  { %1301 = vmatprep.mubr.bf16.mxu1 %v3114_v18 }
 0x3da   :  { %1302 = vmatmul.mubr.bf16.gmra.mrb[68].mxu1 %v3115_v2 }
 0x3db   :  { %1309 = vmatprep.mubr.bf16.mxu1 %v3116_v6 }
 0x3e2   :  { %1310 = vmatmul.mubr.bf16.gmra.mrb[72].mxu1 %v3117_v23 }
 0x3e3   :  { %1317 = vmatprep.mubr.bf16.mxu1 %v3118_v26 }
 0x3ea   :  { %1318 = vmatmul.mubr.bf16.gmra.mrb[76].mxu1 %v3119_v42 }
 0x3eb   :  { %1325 = vmatprep.mubr.bf16.mxu1 %v3120_v36 }
 0x3f2   :  { %1326 = vmatmul.mubr.bf16.gmra.mrb[80].mxu1 %v3121_v29 }
 0x3f3   :  { %1333 = vmatprep.mubr.bf16.mxu1 %v3122_v32 }
 0x3fa   :  { %1334 = vmatmul.mubr.bf16.gmra.mrb[84].mxu1 %v3123_v60 }
 0x3fb   :  { %1341 = vmatprep.mubr.bf16.mxu1 %v3124_v1 }
 0x402   :  { %1342 = vmatmul.mubr.bf16.gmra.mrb[88].mxu1 %v3125_v35 }
 0x403   :  { %1349 = vmatprep.mubr.bf16.mxu1 %v3126_v38 }
 0x40a   :  { %1350 = vmatmul.mubr.bf16.gmra.mrb[92].mxu1 %v3127_v41 }
 0x40b   :  { %1357 = vmatprep.mubr.bf16.mxu1 %v3128_v44 }
 0x412   :  { %1358 = vmatmul.mubr.bf16.gmra.mrb[96].mxu1 %v3129_v33 }
 0x413   :  { %1365 = vmatprep.mubr.bf16.mxu1 %v3130_v50 }
 0x41a   :  { %1366 = vmatmul.mubr.bf16.gmra.mrb[100].mxu1 %v3131_v24 }
 0x41b   :  { %1373 = vmatprep.mubr.bf16.mxu1 %v3132_v21 }
 0x422   :  { %1374 = vmatmul.mubr.bf16.gmra.mrb[104].mxu1 %v3133_v27 }
 0x423   :  { %1381 = vmatprep.mubr.bf16.mxu1 %v3134_v15 }
 0x42a   :  { %1382 = vmatmul.mubr.bf16.gmra.mrb[108].mxu1 %v3135_v53 }
 0x485   :  { %v1979_v22 = vpop.f32.mrb[48].mxu1 }
 0x486   :  { %v1980_v19 = vpop.f32.mrb[49].mxu1 }
 0x487   :  { %v1981_v4 = vadd.f32 %v1980_v19, %v1979_v22  ;;  %v1982_v8 = vpop.f32.mrb[50].mxu1 }
 0x488   :  { %v1983_v30 = vpop.f32.mrb[51].mxu1 }
 0x489   :  { %v1390_v56 = vmul.f32 %v1981_v4, %v2809_v14  ;;  %v1984_v28 = vadd.f32 %v1983_v30, %v1982_v8 }
 0x48b   :  { %v1391_v31 = vmul.f32 %v1984_v28, %v2815_v3  ;;  %v1422_v17 = vmax.f32 %v1390_v56, 0.0 }
 0x48d   :  { %v1423_v11 = vmax.f32 %v1391_v31, 0.0  ;;  %v1985_v20 = vpop.f32.mrb[52].mxu1 }
 0x48e   :  { %v1986_v57 = vpop.f32.mrb[53].mxu1 }
 0x48f   :  { %v1987_v18 = vadd.f32 %v1986_v57, %v1985_v20  ;;  %v1988_v61 = vpop.f32.mrb[54].mxu1  ;;  %v1454_v2 = vpack.c.bf16 %v1423_v11, %v1422_v17 }
 0x490   :  { %v1989_v6 = vpop.f32.mrb[55].mxu1 }
 0x491   :  { %v1392_v0 = vmul.f32 %v1987_v18, %v2807_v7  ;;  %v1990_v23 = vadd.f32 %v1989_v6, %v1988_v61  ;;  %2203 = vmatprep.mubr.bf16.mxu0 %v1454_v2 }
 0x493   :  { %v1393_v26 = vmul.f32 %v1990_v23, %v2812_v16  ;;  %v1424_v42 = vmax.f32 %v1392_v0, 0.0 }
 0x495   :  { %v1425_v36 = vmax.f32 %v1393_v26, 0.0  ;;  %v1991_v14 = vpop.f32.mrb[56].mxu1 }
 0x496   :  { %v1992_v29 = vpop.f32.mrb[57].mxu1 }
 0x497   :  { %v1455_v32 = vpack.c.bf16 %v1425_v36, %v1424_v42  ;;  %v1993_v3 = vadd.f32 %v1992_v29, %v1991_v14  ;;  %v1994_v60 = vpop.f32.mrb[58].mxu1 }
 0x498   :  { %v1995_v1 = vpop.f32.mrb[59].mxu1 }
 0x499   :  { %v1394_v35 = vmul.f32 %v1993_v3, %v2819_v9  ;;  %v1996_v38 = vadd.f32 %v1995_v1, %v1994_v60  ;;  %2204 = vmatmul.mubr.bf16.vlgmr.msra.gmra.mrb[80].mxu0 %v1455_v32 }
 0x49b   :  { %v1395_v12 = vmul.f32 %v1996_v38, %v2821_v10  ;;  %v1426_v34 = vmax.f32 %v1394_v35, 0.0 }
 0x49d   :  { %v1427_v7 = vmax.f32 %v1395_v12, 0.0  ;;  %v1997_v41 = vpop.f32.mrb[60].mxu1 }
 0x49e   :  { %v1998_v44 = vpop.f32.mrb[61].mxu1 }
 0x49f   :  { %v1999_v25 = vadd.f32 %v1998_v44, %v1997_v41  ;;  %v2000_v16 = vpop.f32.mrb[62].mxu1  ;;  %v1456_v47 = vpack.c.bf16 %v1427_v7, %v1426_v34 }
 0x4a0   :  { %v2001_v33 = vpop.f32.mrb[63].mxu1 }
 0x4a1   :  { %v1396_v50 = vmul.f32 %v1999_v25, %v2823_v13  ;;  %v2002_v5 = vadd.f32 %v2001_v33, %v2000_v16  ;;  %2207 = vmatprep.mubr.bf16.mxu0 %v1456_v47 }
 0x4a3   :  { %v1397_v24 = vmul.f32 %v2002_v5, %v2826_v59  ;;  %v1428_v21 = vmax.f32 %v1396_v50, 0.0 }
 0x4a5   :  { %v1429_v9 = vmax.f32 %v1397_v24, 0.0  ;;  %v2003_v27 = vpop.f32.mrb[64].mxu1 }
 0x4a6   :  { %v2004_v15 = vpop.f32.mrb[65].mxu1 }
 0x4a7   :  { %v2005_v53 = vadd.f32 %v2004_v15, %v2003_v27  ;;  %v2006_v10 = vpop.f32.mrb[66].mxu1  ;;  %v1457_v22 = vpack.c.bf16 %v1429_v9, %v1428_v21 }
 0x4a8   :  { %v2007_v19 = vpop.f32.mrb[67].mxu1 }
 0x4a9   :  { %v1398_v4 = vmul.f32 %v2005_v53, %v2831_v58  ;;  %v2008_v8 = vadd.f32 %v2007_v19, %v2006_v10  ;;  %2208 = vmatmul.mubr.bf16.gmra.mrb[84].mxu0 %v1457_v22 }
 0x4ab   :  { %v1399_v30 = vmul.f32 %v2008_v8, %v2833_v63  ;;  %v1430_v56 = vmax.f32 %v1398_v4, 0.0 }
 0x4ad   :  { %v1431_v13 = vmax.f32 %v1399_v30, 0.0  ;;  %v2009_v28 = vpop.f32.mrb[68].mxu1 }
 0x4ae   :  { %v2010_v31 = vpop.f32.mrb[69].mxu1 }
 0x4af   :  { %v2011_v17 = vadd.f32 %v2010_v31, %v2009_v28  ;;  %v2012_v59 = vpop.f32.mrb[70].mxu1  ;;  %v1458_v11 = vpack.c.bf16 %v1431_v13, %v1430_v56 }
 0x4b0   :  { %v2013_v20 = vpop.f32.mrb[71].mxu1 }
 0x4b1   :  { %v1400_v57 = vmul.f32 %v2011_v17, %v2835_v55  ;;  %v2014_v18 = vadd.f32 %v2013_v20, %v2012_v59  ;;  %2211 = vmatprep.mubr.bf16.mxu0 %v1458_v11 }
 0x4b3   :  { %v1401_v61 = vmul.f32 %v2014_v18, %v2838_v52  ;;  %v1432_v2 = vmax.f32 %v1400_v57, 0.0 }
 0x4b5   :  { %v1433_v58 = vmax.f32 %v1401_v61, 0.0  ;;  %v2015_v6 = vpop.f32.mrb[72].mxu1 }
 0x4b6   :  { %v2016_v0 = vpop.f32.mrb[73].mxu1 }
 0x4b7   :  { %v2017_v23 = vadd.f32 %v2016_v0, %v2015_v6  ;;  %v2018_v63 = vpop.f32.mrb[74].mxu1  ;;  %v1459_v26 = vpack.c.bf16 %v1433_v58, %v1432_v2 }
 0x4b8   :  { %v2019_v42 = vpop.f32.mrb[75].mxu1 }
 0x4b9   :  { %v1402_v36 = vmul.f32 %v2017_v23, %v2843_v51  ;;  %v2020_v14 = vadd.f32 %v2019_v42, %v2018_v63  ;;  %2212 = vmatmul.mubr.bf16.gmra.mrb[88].mxu0 %v1459_v26  ;;  %v3136_v23 = vld [vmem:[#allocation20_spill] sm:$0xff] }
 0x4bb   :  { %v1403_v29 = vmul.f32 %v2020_v14, %v2845_v62  ;;  %v1434_v32 = vmax.f32 %v1402_v36, 0.0 }
 0x4bd   :  { %v1435_v55 = vmax.f32 %v1403_v29, 0.0  ;;  %v2021_v3 = vpop.f32.mrb[76].mxu1 }
 0x4be   :  { %v2022_v60 = vpop.f32.mrb[77].mxu1 }
 0x4bf   :  { %v2023_v1 = vadd.f32 %v2022_v60, %v2021_v3  ;;  %v2024_v52 = vpop.f32.mrb[78].mxu1  ;;  %v1460_v35 = vpack.c.bf16 %v1435_v55, %v1434_v32  ;;  %v3137_v55 = vld [vmem:[#allocation21_spill] sm:$0xff] }
 0x4c0   :  { %v2025_v38 = vpop.f32.mrb[79].mxu1 }
 0x4c1   :  { %v1404_v12 = vmul.f32 %v2023_v1, %v2847_v49  ;;  %v2026_v34 = vadd.f32 %v2025_v38, %v2024_v52  ;;  %2215 = vmatprep.mubr.bf16.mxu0 %v1460_v35  ;;  %v3138_v1 = vld [vmem:[#allocation22_spill] sm:$0xff] }
 0x4c3   :  { %v1405_v7 = vmul.f32 %v2026_v34, %v2850_v46  ;;  %v1436_v41 = vmax.f32 %v1404_v12, 0.0 }
 0x4c5   :  { %v1437_v51 = vmax.f32 %v1405_v7, 0.0  ;;  %v2027_v44 = vpop.f32.mrb[80].mxu1 }
 0x4c6   :  { %v2028_v25 = vpop.f32.mrb[81].mxu1 }
 0x4c7   :  { %v2029_v16 = vadd.f32 %v2028_v25, %v2027_v44  ;;  %v2030_v62 = vpop.f32.mrb[82].mxu1  ;;  %v1461_v47 = vpack.c.bf16 %v1437_v51, %v1436_v41  ;;  %v3139_v44 = vld [vmem:[#allocation23_spill] sm:$0xff] }
 0x4c8   :  { %v2031_v33 = vpop.f32.mrb[83].mxu1 }
 0x4c9   :  { %v1406_v50 = vmul.f32 %v2029_v16, %v2855_v45  ;;  %v2032_v5 = vadd.f32 %v2031_v33, %v2030_v62  ;;  %2216 = vmatmul.mubr.bf16.gmra.mrb[92].mxu0 %v1461_v47  ;;  %v3140_v62 = vld [vmem:[#allocation24_spill] sm:$0xff] }
 0x4cb   :  { %v1407_v24 = vmul.f32 %v2032_v5, %v2857_v54  ;;  %v1438_v21 = vmax.f32 %v1406_v50, 0.0 }
 0x4cd   :  { %v1439_v49 = vmax.f32 %v1407_v24, 0.0  ;;  %v2033_v9 = vpop.f32.mrb[84].mxu1 }
 0x4ce   :  { %v2034_v27 = vpop.f32.mrb[85].mxu1 }
 0x4cf   :  { %v2035_v15 = vadd.f32 %v2034_v27, %v2033_v9  ;;  %v2036_v46 = vpop.f32.mrb[86].mxu1  ;;  %v1462_v53 = vpack.c.bf16 %v1439_v49, %v1438_v21 }
 0x4d0   :  { %v2037_v10 = vpop.f32.mrb[87].mxu1 }
 0x4d1   :  { %v1408_v22 = vmul.f32 %v2035_v15, %v2859_v43  ;;  %v2038_v19 = vadd.f32 %v2037_v10, %v2036_v46  ;;  %2219 = vmatprep.mubr.bf16.mxu0 %v1462_v53  ;;  %v3141_v15 = vld [vmem:[#allocation25_spill] sm:$0xff]  ;;  %v3142_v10 = vld [vmem:[#allocation26_spill] sm:$0xff] }
 0x4d3   :  { %v1409_v4 = vmul.f32 %v2038_v19, %v2862_v40  ;;  %v1440_v8 = vmax.f32 %v1408_v22, 0.0 }
 0x4d5   :  { %v1441_v45 = vmax.f32 %v1409_v4, 0.0  ;;  %v2039_v30 = vpop.f32.mrb[88].mxu1 }
 0x4d6   :  { %v2040_v56 = vpop.f32.mrb[89].mxu1 }
 0x4d7   :  { %v2041_v13 = vadd.f32 %v2040_v56, %v2039_v30  ;;  %v2042_v54 = vpop.f32.mrb[90].mxu1  ;;  %v1463_v28 = vpack.c.bf16 %v1441_v45, %v1440_v8 }
 0x4d8   :  { %v2043_v31 = vpop.f32.mrb[91].mxu1 }
 0x4d9   :  { %v1410_v17 = vmul.f32 %v2041_v13, %v2867_v39  ;;  %v2044_v59 = vadd.f32 %v2043_v31, %v2042_v54  ;;  %2220 = vmatmul.mubr.bf16.gmra.mrb[96].mxu0 %v1463_v28  ;;  %v3143_v28 = vld [vmem:[#allocation27_spill] sm:$0xff] }
 0x4db   :  { %v1411_v11 = vmul.f32 %v2044_v59, %v2869_v48  ;;  %v1442_v20 = vmax.f32 %v1410_v17, 0.0  ;;  %v3144_v59 = vld [vmem:[#allocation28_spill] sm:$0xff] }
 0x4dd   :  { %v1443_v43 = vmax.f32 %v1411_v11, 0.0  ;;  %v2045_v57 = vpop.f32.mrb[92].mxu1 }
 0x4de   :  { %v2046_v18 = vpop.f32.mrb[93].mxu1 }
 0x4df   :  { %v2047_v61 = vadd.f32 %v2046_v18, %v2045_v57  ;;  %v2048_v40 = vpop.f32.mrb[94].mxu1  ;;  %v1464_v2 = vpack.c.bf16 %v1443_v43, %v1442_v20  ;;  %v2999_v18 = vld [vmem:[#allocation13] ss:$0 sm:$0xff] }
 0x4e0   :  { %v2049_v58 = vpop.f32.mrb[95].mxu1 }
 0x4e1   :  { %v1412_v6 = vmul.f32 %v2047_v61, %v2871_v37  ;;  %v2050_v0 = vadd.f32 %v2049_v58, %v2048_v40  ;;  %2223 = vmatprep.mubr.bf16.mxu0 %v1464_v2 }
 0x4e3   :  { %v1413_v63 = vmul.f32 %v2050_v0, %v3136_v23  ;;  %v1444_v26 = vmax.f32 %v1412_v6, 0.0 }
 0x4e5   :  { %v1445_v39 = vmax.f32 %v1413_v63, 0.0  ;;  %v2051_v42 = vpop.f32.mrb[96].mxu1 }
 0x4e6   :  { %v2052_v36 = vpop.f32.mrb[97].mxu1 }
 0x4e7   :  { %v2053_v14 = vadd.f32 %v2052_v36, %v2051_v42  ;;  %v2054_v48 = vpop.f32.mrb[98].mxu1  ;;  %v1465_v29 = vpack.c.bf16 %v1445_v39, %v1444_v26 }
 0x4e8   :  { %v2055_v32 = vpop.f32.mrb[99].mxu1 }
 0x4e9   :  { %v1414_v3 = vmul.f32 %v2053_v14, %v3137_v55  ;;  %v2056_v60 = vadd.f32 %v2055_v32, %v2054_v48  ;;  %2224 = vmatmul.mubr.bf16.gmra.mrb[100].mxu0 %v1465_v29 }
 0x4eb   :  { %v1415_v52 = vmul.f32 %v2056_v60, %v3138_v1  ;;  %v1446_v35 = vmax.f32 %v1414_v3, 0.0 }
 0x4ed   :  { %v1447_v37 = vmax.f32 %v1415_v52, 0.0  ;;  %v2057_v38 = vpop.f32.mrb[100].mxu1 }
 0x4ee   :  { %v2058_v12 = vpop.f32.mrb[101].mxu1 }
 0x4ef   :  { %v2059_v34 = vadd.f32 %v2058_v12, %v2057_v38  ;;  %v2060_v7 = vpop.f32.mrb[102].mxu1  ;;  %v1466_v41 = vpack.c.bf16 %v1447_v37, %v1446_v35 }
 0x4f0   :  { %v2061_v51 = vpop.f32.mrb[103].mxu1 }
 0x4f1   :  { %v1416_v25 = vmul.f32 %v2059_v34, %v3139_v44  ;;  %v2062_v16 = vadd.f32 %v2061_v51, %v2060_v7  ;;  %2227 = vmatprep.mubr.bf16.mxu0 %v1466_v41 }
 0x4f3   :  { %v1417_v47 = vmul.f32 %v2062_v16, %v3140_v62  ;;  %v1448_v33 = vmax.f32 %v1416_v25, 0.0 }
 0x4f5   :  { %v1449_v50 = vmax.f32 %v1417_v47, 0.0  ;;  %v2063_v5 = vpop.f32.mrb[104].mxu1 }
 0x4f6   :  { %v2064_v24 = vpop.f32.mrb[105].mxu1 }
 0x4f7   :  { %v2065_v21 = vadd.f32 %v2064_v24, %v2063_v5  ;;  %v2066_v49 = vpop.f32.mrb[106].mxu1  ;;  %v1467_v9 = vpack.c.bf16 %v1449_v50, %v1448_v33 }
 0x4f8   :  { %v2067_v27 = vpop.f32.mrb[107].mxu1 }
 0x4f9   :  { %v1418_v46 = vmul.f32 %v2065_v21, %v3141_v15  ;;  %v2068_v53 = vadd.f32 %v2067_v27, %v2066_v49  ;;  %2228 = vmatmul.mubr.bf16.gmra.mrb[104].mxu0 %v1467_v9 }
 0x4fb   :  { %v1419_v22 = vmul.f32 %v2068_v53, %v3142_v10  ;;  %v1450_v19 = vmax.f32 %v1418_v46, 0.0 }
 0x4fd   :  { %v1451_v4 = vmax.f32 %v1419_v22, 0.0  ;;  %v2069_v8 = vpop.f32.mrb[108].mxu1 }
 0x4fe   :  { %v2070_v45 = vpop.f32.mrb[109].mxu1 }
 0x4ff   :  { %v2071_v30 = vadd.f32 %v2070_v45, %v2069_v8  ;;  %v2072_v56 = vpop.f32.mrb[110].mxu1  ;;  %v1468_v13 = vpack.c.bf16 %v1451_v4, %v1450_v19 }
 0x500   :  { %v2073_v54 = vpop.f32.mrb[111].mxu1 }
 0x501   :  { %v1420_v31 = vmul.f32 %v2071_v30, %v3143_v28  ;;  %v2074_v17 = vadd.f32 %v2073_v54, %v2072_v56  ;;  %2231 = vmatprep.mubr.bf16.mxu1 %v1468_v13 }
 0x503   :  { %v1421_v11 = vmul.f32 %v2074_v17, %v3144_v59  ;;  %v1452_v20 = vmax.f32 %v1420_v31, 0.0 }
 0x505   :  { %v1453_v43 = vmax.f32 %v1421_v11, 0.0 }
 0x507   :  { %v1469_v57 = vpack.c.bf16 %v1453_v43, %v1452_v20 }
 0x509   :  { %2232 = vmatmul.mubr.bf16.vlgmr.msra.gmra.mrb[112].mxu1 %v1469_v57 }
 0x56c   :  { %v2205_v61 = vpop.f32.mrb[80].mxu0 }
 0x56d   :  { %v1584_v40 = vadd.f32 %v2205_v61, %v2999_v18  ;;  %v1575_v2 = vpop.f32.mrb[81].mxu0 }
 0x56e   :  { %v1576_v58 = vadd.f32 %v2999_v18, %v1575_v2  ;;  %v2206_v6 = vpop.f32.mrb[82].mxu0 }
 0x56f   :  { %1704 = vst [vmem:[#allocation14 + $0x10] sm:$0xff] %v1584_v40  ;;  %v1587_v0 = vadd.f32 %v2206_v6, %v2999_v18  ;;  %v1578_v23 = vpop.f32.mrb[83].mxu0 }
 0x570   :  { %1702 = vst [vmem:[#allocation14] sm:$0xff] %v1576_v58  ;;  %v1579_v63 = vadd.f32 %v2999_v18, %v1578_v23 }
 0x571   :  { %1705 = vst [vmem:[#allocation14 + $0x18] sm:$0xff] %v1587_v0 }
 0x572   :  { %1703 = vst [vmem:[#allocation14 + $0x8] sm:$0xff] %v1579_v63 }
 0x57c   :  { %v2209_v26 = vpop.f32.mrb[84].mxu0 }
 0x57d   :  { %v1600_v39 = vadd.f32 %v2209_v26, %v2999_v18  ;;  %v1591_v42 = vpop.f32.mrb[85].mxu0 }
 0x57e   :  { %v1592_v36 = vadd.f32 %v2999_v18, %v1591_v42  ;;  %v2210_v14 = vpop.f32.mrb[86].mxu0 }
 0x57f   :  { %1708 = vst [vmem:[#allocation14 + $0x30] sm:$0xff] %v1600_v39  ;;  %v1603_v48 = vadd.f32 %v2210_v14, %v2999_v18  ;;  %v1594_v29 = vpop.f32.mrb[87].mxu0 }
 0x580   :  { %1706 = vst [vmem:[#allocation14 + $0x20] sm:$0xff] %v1592_v36  ;;  %v1595_v32 = vadd.f32 %v2999_v18, %v1594_v29 }
 0x581   :  { %1709 = vst [vmem:[#allocation14 + $0x38] sm:$0xff] %v1603_v48 }
 0x582   :  { %1707 = vst [vmem:[#allocation14 + $0x28] sm:$0xff] %v1595_v32 }
 0x58c   :  { %v2213_v55 = vpop.f32.mrb[88].mxu0 }
 0x58d   :  { %v1616_v3 = vadd.f32 %v2213_v55, %v2999_v18  ;;  %v1607_v60 = vpop.f32.mrb[89].mxu0 }
 0x58e   :  { %v1608_v1 = vadd.f32 %v2999_v18, %v1607_v60  ;;  %v2214_v52 = vpop.f32.mrb[90].mxu0 }
 0x58f   :  { %1712 = vst [vmem:[#allocation14 + $0x50] sm:$0xff] %v1616_v3  ;;  %v1619_v35 = vadd.f32 %v2214_v52, %v2999_v18  ;;  %v1610_v37 = vpop.f32.mrb[91].mxu0 }
 0x590   :  { %1710 = vst [vmem:[#allocation14 + $0x40] sm:$0xff] %v1608_v1  ;;  %v1611_v38 = vadd.f32 %v2999_v18, %v1610_v37 }
 0x591   :  { %1713 = vst [vmem:[#allocation14 + $0x58] sm:$0xff] %v1619_v35 }
 0x592   :  { %1711 = vst [vmem:[#allocation14 + $0x48] sm:$0xff] %v1611_v38 }
 0x59c   :  { %v2217_v12 = vpop.f32.mrb[92].mxu0 }
 0x59d   :  { %v1632_v34 = vadd.f32 %v2217_v12, %v2999_v18  ;;  %v1623_v7 = vpop.f32.mrb[93].mxu0 }
 0x59e   :  { %v1624_v41 = vadd.f32 %v2999_v18, %v1623_v7  ;;  %v2218_v51 = vpop.f32.mrb[94].mxu0 }
 0x59f   :  { %1716 = vst [vmem:[#allocation14 + $0x70] sm:$0xff] %v1632_v34  ;;  %v1635_v44 = vadd.f32 %v2218_v51, %v2999_v18  ;;  %v1626_v25 = vpop.f32.mrb[95].mxu0 }
 0x5a0   :  { %1714 = vst [vmem:[#allocation14 + $0x60] sm:$0xff] %v1624_v41  ;;  %v1627_v16 = vadd.f32 %v2999_v18, %v1626_v25 }
 0x5a1   :  { %1717 = vst [vmem:[#allocation14 + $0x78] sm:$0xff] %v1635_v44 }
 0x5a2   :  { %1715 = vst [vmem:[#allocation14 + $0x68] sm:$0xff] %v1627_v16 }
 0x5ac   :  { %v2221_v62 = vpop.f32.mrb[96].mxu0 }
 0x5ad   :  { %v1648_v47 = vadd.f32 %v2221_v62, %v2999_v18  ;;  %v1639_v33 = vpop.f32.mrb[97].mxu0 }
 0x5ae   :  { %v1640_v50 = vadd.f32 %v2999_v18, %v1639_v33  ;;  %v2222_v5 = vpop.f32.mrb[98].mxu0 }
 0x5af   :  { %1720 = vst [vmem:[#allocation14 + $0x90] sm:$0xff] %v1648_v47  ;;  %v1651_v24 = vadd.f32 %v2222_v5, %v2999_v18  ;;  %v1642_v21 = vpop.f32.mrb[99].mxu0 }
 0x5b0   :  { %1718 = vst [vmem:[#allocation14 + $0x80] sm:$0xff] %v1640_v50  ;;  %v1643_v49 = vadd.f32 %v2999_v18, %v1642_v21 }
 0x5b1   :  { %1721 = vst [vmem:[#allocation14 + $0x98] sm:$0xff] %v1651_v24 }
 0x5b2   :  { %1719 = vst [vmem:[#allocation14 + $0x88] sm:$0xff] %v1643_v49 }
 0x5bc   :  { %v2225_v9 = vpop.f32.mrb[100].mxu0 }
 0x5bd   :  { %v1664_v27 = vadd.f32 %v2225_v9, %v2999_v18  ;;  %v1655_v15 = vpop.f32.mrb[101].mxu0 }
 0x5be   :  { %v1656_v46 = vadd.f32 %v2999_v18, %v1655_v15  ;;  %v2226_v53 = vpop.f32.mrb[102].mxu0 }
 0x5bf   :  { %1724 = vst [vmem:[#allocation14 + $0xb0] sm:$0xff] %v1664_v27  ;;  %v1667_v10 = vadd.f32 %v2226_v53, %v2999_v18  ;;  %v1658_v22 = vpop.f32.mrb[103].mxu0 }
 0x5c0   :  { %1722 = vst [vmem:[#allocation14 + $0xa0] sm:$0xff] %v1656_v46  ;;  %v1659_v19 = vadd.f32 %v2999_v18, %v1658_v22 }
 0x5c1   :  { %1725 = vst [vmem:[#allocation14 + $0xb8] sm:$0xff] %v1667_v10 }
 0x5c2   :  { %1723 = vst [vmem:[#allocation14 + $0xa8] sm:$0xff] %v1659_v19 }
 0x5cc   :  { %v2229_v4 = vpop.f32.mrb[104].mxu0 }
 0x5cd   :  { %v1680_v8 = vadd.f32 %v2229_v4, %v2999_v18  ;;  %v1671_v45 = vpop.f32.mrb[105].mxu0 }
 0x5ce   :  { %v1672_v30 = vadd.f32 %v2999_v18, %v1671_v45  ;;  %v2230_v56 = vpop.f32.mrb[106].mxu0 }
 0x5cf   :  { %1728 = vst [vmem:[#allocation14 + $0xd0] sm:$0xff] %v1680_v8  ;;  %v1683_v13 = vadd.f32 %v2230_v56, %v2999_v18  ;;  %v1674_v54 = vpop.f32.mrb[107].mxu0 }
 0x5d0   :  { %1726 = vst [vmem:[#allocation14 + $0xc0] sm:$0xff] %v1672_v30  ;;  %v1675_v28 = vadd.f32 %v2999_v18, %v1674_v54 }
 0x5d1   :  { %1729 = vst [vmem:[#allocation14 + $0xd8] sm:$0xff] %v1683_v13 }
 0x5d2   :  { %1727 = vst [vmem:[#allocation14 + $0xc8] sm:$0xff] %v1675_v28 }
 0x5dc   :  { %v2233_v31 = vpop.f32.mrb[112].mxu1 }
 0x5dd   :  { %v1696_v17 = vadd.f32 %v2233_v31, %v2999_v18  ;;  %v1687_v59 = vpop.f32.mrb[113].mxu1 }
 0x5de   :  { %v1688_v11 = vadd.f32 %v2999_v18, %v1687_v59  ;;  %v2234_v20 = vpop.f32.mrb[114].mxu1 }
 0x5df   :  { %1732 = vst [vmem:[#allocation14 + $0xf0] sm:$0xff] %v1696_v17  ;;  %v1699_v43 = vadd.f32 %v2234_v20, %v2999_v18  ;;  %v1690_v57 = vpop.f32.mrb[115].mxu1 }
 0x5e0   :  { %1730 = vst [vmem:[#allocation14 + $0xe0] sm:$0xff] %v1688_v11  ;;  %v1691_v61 = vadd.f32 %v2999_v18, %v1690_v57 }
 0x5e1   :  { %1733 = vst [vmem:[#allocation14 + $0xf8] sm:$0xff] %v1699_v43 }
 0x5e2   :  { %1731 = vst [vmem:[#allocation14 + $0xe8] sm:$0xff] %v1691_v61 }
 0x5e3   :  { %2477 = shalt.err (!%p2474_p4)
}
 0x5e4   :  { %s2478_s20 = scalar_lea.hbm %s3055_s7, 4096 }
 0x5e5   :  { %p2479_p5 = scmp.ne.s32.totalorder %s3055_s7, %s2478_s20  ;;  %p2482_p6 = scmp.lt.u32.totalorder %s2478_s20, %s3055_s7 }
 0x5e7   :  { %p2484_p7 = pnand %p2482_p6, %p2479_p5 }
 0x5e9   :  { %2487 = shalt.err (!%p2484_p7)
}
 0x5ea   :  { %1745 = dma.vmem_to_hbm [thread:$0]  %s1740_s10, 4096, %s3055_s7, [#allocation4], %s2506_s5, %s2506_s5, %s2507_s18  }
 0x5eb   :  { %2496 = dma.done.wait [#allocation4], 4096  }
 0x5ec   :  { %2497 = vsyncadd [#allocation4], 4294963200 }
 0x5ed   :  { %1749 = vsyncpa [#allocation3], 1 }
 0x5ee   :  { %1750 = vsyncpa [#allocation6], 1 }
 0x5ef   :  { %1751 = vsyncpa [#allocation9], 1 }
 0x5f0   :  { %1752 = vsyncpa [#allocation12], 1 }
 0x5f1   :  { %1753 = vsyncpa [#allocation4], 1 }

</bundles_post_ra>
